<compile_context>
chip_gen: v5e
topology: v5e:2x2
jax: 0.10.0
libtpu: 0.0.40
codegen_flags: <defaults>
</compile_context>

<pallas_src>
import jax
import jax.numpy as jnp
from jax.experimental import pallas as pl
from jax.experimental.pallas import tpu as pltpu

N      = 8        # batch (= RNN sequence length)
L      = 310      # signal length -> conv1 out 30 -> conv2 out 2 -> 2*64 = 128 = fc1 in
K      = 20       # conv kernel size
STRIDE = 10
L1     = (L - K) // STRIDE + 1      # 30
L2     = (L1 - K) // STRIDE + 1     # 2
C      = 64       # channels
CPAD   = 128      # one full vreg lane width (2 packed conv2 taps per block)
K1PAD  = 32       # conv1 im2col K zero-padded 20 -> 32 (sublane aligned)

# tensor_reverse is torch.ones(...) in the source file => second branch == first
# => the RNN head is identically zero.  If this ever changes, flip the flag
# (the non-trivial head path below then needs the second branch fed in).
TENSOR_REVERSE_IS_ALL_ONES = True

_VMEM = pl.BlockSpec(memory_space=pltpu.MemorySpace.VMEM)
_SMEM = pl.BlockSpec(memory_space=pltpu.MemorySpace.SMEM)
_ANY  = pl.BlockSpec(memory_space=pl.ANY)


# ----------------------------- fused kernel -------------------------------- #
def _net_kernel(p_ref, w1_ref, w2_hbm_ref, wfc1_ref, wfc2_ref, wih_ref,
                whh_ref, gap_ref, amp_ref,
                out_ref, ybr_ref,
                slab_ref, w2_vmem, w2_sem):
    """conv1 -> relu -> conv2 -> relu -> fc1 -> relu -> fc2 -> (zero) RNN head."""
    # Start the conv2-weight DMA now; it overlaps with conv1 + slab assembly
    # (review item: hide ~0.5-0.8 us of weight DMA on v5e/v6e; harmless on v7x).
    w2_cp = pltpu.make_async_copy(w2_hbm_ref, w2_vmem, w2_sem)
    w2_cp.start()

    # conv1 as one im2col matmul.  w1p columns >= C are zero, so after ReLU the
    # lanes 64..127 of h1 are EXACTLY zero -- the tap-packing below relies on it.
    h1 = jnp.maximum(
        jnp.dot(p_ref[...], w1_ref[...], preferred_element_type=jnp.float32),
        0.0)                                                    # (L1*N, CPAD)

    # conv2 slab with two taps packed per 128-lane vreg: lanes 0..63 = tap k,
    # lanes 64..127 = tap k+1 (roll moves its channels up; its upper half is 0).
    # Each packed (8,128) piece is written once to its final place in a VMEM
    # scratch -> slab is materialized exactly once.
    for p in range(L2):
        for kp in range(K // 2):
            k0 = p * STRIDE + 2 * kp
            lo = h1[k0 * N:(k0 + 1) * N, :]
            hi = h1[(k0 + 1) * N:(k0 + 2) * N, :]
            slab_ref[p * N:(p + 1) * N, kp * CPAD:(kp + 1) * CPAD] = (
                lo + pltpu.roll(hi, shift=C, axis=1))

    # conv2 as ONE deep-K MXU matmul against the packed (K*C, C) weight.
    w2_cp.wait()
    h2 = jnp.maximum(
        jnp.dot(slab_ref[...], w2_vmem[...], preferred_element_type=jnp.float32),
        0.0)                                                    # (L2*N, C)

    # fc1 fused into one (N, 2C) @ (2C, C) matmul: lane-concat the two conv2
    # output positions; PyTorch NCL flatten order is folded into wfc1p.
    h2f = jnp.concatenate([h2[0:N, :], h2[N:2 * N, :]], axis=1)  # (N, 2C)
    h3 = jnp.maximum(
        jnp.dot(h2f, wfc1_ref[...], preferred_element_type=jnp.float32), 0.0)

    # fc2 -> branch output y (debug/verification output; droppable in prod).
    y = jnp.dot(h3, wfc2_ref[...], preferred_element_type=jnp.float32)  # (N, C)
    ybr_ref[...] = y

    if TENSOR_REVERSE_IS_ALL_ONES:
        # y_ == y  =>  (y - y_)/2 == 0  =>  rnn input 0  =>  rnn output 0
        # =>  relu(+-0 - gap) == 0  =>  tanh(0) == 0.  Head is provably zero.
        out_ref[...] = jnp.zeros(out_ref.shape, out_ref.dtype)
    else:
        # TODO(synk): a non-trivial tensor_reverse needs the second branch
        # (tensor_reverse * x) fed into the kernel; with all-ones it equals y.
        ydiff = (y - y) * 0.5                                    # (N, C)
        a = jnp.dot(ydiff, wih_ref[...],
                    preferred_element_type=jnp.float32)          # (N, 1)
        whh = whh_ref[0]
        h = jnp.zeros((1, 1), jnp.float32)
        hs = []
        for t in range(N):               # static unroll, static sublane slices
            h = jnp.tanh(a[t:t + 1, :] + whh * h)
            hs.append(h)
        hs = jnp.concatenate(hs, axis=0)                         # (N, 1)
        gap = 0.4 + jnp.abs(jnp.tanh(gap_ref[0]) * 0.6)
        scale = amp_ref[0] + 2.0 / (1.0 - gap)
        yh = jnp.maximum(hs - gap, 0.0) - jnp.maximum(-hs - gap, 0.0)
        out_ref[...] = jnp.tanh(yh * scale)


# ------------------------------ glue ---------------------------------------- #
def prepare_params(params):
    """One-time weight re-layouts (hoisted out of the per-call forward path)."""
    w1, w2, wfc1, wfc2, wih, whh, gap_p, amp_p = params
    # conv1 weight (C, 1, K) -> (K1PAD, CPAD); rows >= K and columns >= C zero.
    w1t = jnp.transpose(w1[:, 0, :])                                    # (K, C)
    w1p = jnp.zeros((K1PAD, CPAD), jnp.float32).at[:K, :C].set(w1t)
    # conv2 weight (Cout, Cin, K) -> (K*C, Cout), row k*C + cin (tap-packed,
    # lane-dense: no zero padding).
    w2pk = jnp.transpose(w2, (2, 1, 0)).reshape(K * C, C)               # (1280, 64)
    # fc1 weight: PyTorch flatten index cin*L2 + p -> packed rows p*C + cin.
    wfc1p = jnp.transpose(wfc1.reshape(C, C, L2), (2, 1, 0)).reshape(L2 * C, C)
    wfc2t = jnp.transpose(wfc2)                                         # (Cin, Cout)
    wiht = jnp.transpose(wih)                                           # (C, 1)
    return (w1p, w2pk, wfc1p, wfc2t, wiht,
            whh.reshape(1), gap_p.reshape(1), amp_p.reshape(1))


def _im2col(x2d):
    """conv1 im2col, position-major rows l*N + n.  Tiny XLA gather; the windows
    are stride-10 lane slices so an in-kernel gather would be unaligned."""
    idx = jnp.arange(L1)[:, None] * STRIDE + jnp.arange(K)[None, :]     # (L1, K)
    patches = x2d[:, idx]                                               # (N, L1, K)
    patches = jnp.transpose(patches, (1, 0, 2)).reshape(L1 * N, K)
    return jnp.pad(patches, ((0, 0), (0, K1PAD - K)))                   # (L1*N, 32)


def _net_pallas(x2d, prep):
    w1p, w2pk, wfc1p, wfc2t, wiht, whh1, gap1, amp1 = prep
    patches = _im2col(x2d)
    return pl.pallas_call(
        _net_kernel,
        out_shape=(jax.ShapeDtypeStruct((N, 1), jnp.float32),   # head output
                   jax.ShapeDtypeStruct((N, C), jnp.float32)),  # branch (fc2) output
        in_specs=[_VMEM, _VMEM, _ANY, _VMEM, _VMEM, _VMEM, _SMEM, _SMEM, _SMEM],
        out_specs=(_VMEM, _VMEM),
        scratch_shapes=[
            pltpu.VMEM((L2 * N, (K // 2) * CPAD), jnp.float32),  # conv2 slab (16,1280)
            pltpu.VMEM((K * C, C), jnp.float32),                 # conv2 weight landing
            pltpu.SemaphoreType.DMA(()),                         # its DMA semaphore
        ],
    )(patches, w1p, w2pk, wfc1p, wfc2t, wiht, whh1, gap1, amp1)


def net_forward(x, prep):
    """x: (N, 1, L) float32 (PyTorch NCL); returns (1, N) like Net.forward."""
    out, _ = _net_pallas(x[:, 0, :], prep)
    return out.reshape(1, N)


# --------------------------- pure-JAX reference ----------------------------- #
def _branch_ref(x2d, w1, w2, wfc1, wfc2):
    idx1 = jnp.arange(L1)[:, None] * STRIDE + jnp.arange(K)[None, :]
    p1 = x2d[:, idx1]                                                   # (N, L1, K)
    h1 = jax.nn.relu(jnp.einsum('nlk,ok->nlo', p1, w1[:, 0, :]))        # (N, L1, C)
    idx2 = jnp.arange(L2)[:, None] * STRIDE + jnp.arange(K)[None, :]
    p2 = h1[:, idx2, :]                                                 # (N, L2, K, C)
    h2 = jax.nn.relu(jnp.einsum('npkc,ock->npo', p2, w2))               # (N, L2, Cout)
    flat = jnp.transpose(h2, (0, 2, 1)).reshape(N, C * L2)              # NCL flatten
    h3 = jax.nn.relu(flat @ wfc1.T)
    return h3 @ wfc2.T


def _forward_ref(x, params):
    w1, w2, wfc1, wfc2, wih, whh, gap_p, amp_p = params
    x2d = x[:, 0, :]
    y_a = _branch_ref(x2d, w1, w2, wfc1, wfc2)
    y_b = _branch_ref(jnp.ones_like(x2d) * x2d, w1, w2, wfc1, wfc2)
    yd = (y_a - y_b) * 0.5
    a = yd @ wih.T                                                      # (N, 1)

    def step(h, a_t):
        h = jnp.tanh(a_t + whh[0, 0] * h)
        return h, h

    _, hs = jax.lax.scan(step, jnp.zeros((1,), jnp.float32), a)         # (N, 1)
    gap = 0.4 + jnp.abs(jnp.tanh(gap_p) * 0.6)
    y = jax.nn.relu(hs - gap) - jax.nn.relu(-hs - gap)
    y = jnp.tanh(y * (amp_p + 2.0 / (1.0 - gap)))
    return y.reshape(1, N)


# ------------------------------- main ---------------------------------------- #
if __name__ == "__main__":
    key = jax.random.PRNGKey(0)
    ks = jax.random.split(key, 7)
    w1   = 0.05 * jax.random.normal(ks[0], (C, 1, K), jnp.float32)      # conv1 weight
    w2   = 0.05 * jax.random.normal(ks[1], (C, C, K), jnp.float32)      # conv2 weight
    wfc1 = 0.05 * jax.random.normal(ks[2], (C, C * L2), jnp.float32)    # fc1 weight
    wfc2 = 0.05 * jax.random.normal(ks[3], (C, C), jnp.float32)         # fc2 weight
    wih  = 0.05 * jax.random.normal(ks[4], (1, C), jnp.float32)         # rnn W_ih
    whh  = 0.05 * jax.random.normal(ks[5], (1, 1), jnp.float32)         # rnn W_hh
    gap_p = jnp.asarray(-0.3, jnp.float32)
    amp_p = jnp.asarray(5.0, jnp.float32)
    params = (w1, w2, wfc1, wfc2, wih, whh, gap_p, amp_p)

    x = jax.random.normal(ks[6], (N, 1, L), jnp.float32)

    prep = prepare_params(params)            # one-time weight re-layouts (hoisted)
    fwd = jax.jit(net_forward)
    out = jax.block_until_ready(fwd(x, prep))

    # correctness checks against a plain-JAX reference
    assert out.shape == (1, N)
    assert bool(jnp.all(jnp.isfinite(out)))
    ref = _forward_ref(x, params)
    assert bool(jnp.allclose(out, ref, atol=2e-2, rtol=2e-2))

    # the conv/fc branch is the non-trivial compute -> check it directly
    _, y_branch = jax.jit(_net_pallas)(x[:, 0, :], prep)
    y_branch = jax.block_until_ready(y_branch)
    y_branch_ref = _branch_ref(x[:, 0, :], w1, w2, wfc1, wfc2)
    assert bool(jnp.allclose(y_branch, y_branch_ref, atol=2e-2, rtol=2e-2))

    print("KERNEL_OK")
</pallas_src>

<mosaic_0001>
module attributes {stable_mosaic.version = 11 : i64} {
  func.func @_net_kernel(%arg0: memref<240x32xf32, #tpu.memory_space<vmem>>, %arg1: memref<32x128xf32, #tpu.memory_space<vmem>>, %arg2: memref<1280x64xf32, #tpu.memory_space<any>>, %arg3: memref<128x64xf32, #tpu.memory_space<vmem>>, %arg4: memref<64x64xf32, #tpu.memory_space<vmem>>, %arg5: memref<64x1xf32, #tpu.memory_space<vmem>>, %arg6: memref<1xf32, #tpu.memory_space<smem>>, %arg7: memref<1xf32, #tpu.memory_space<smem>>, %arg8: memref<1xf32, #tpu.memory_space<smem>>, %arg9: memref<8x1xf32, #tpu.memory_space<vmem>>, %arg10: memref<8x64xf32, #tpu.memory_space<vmem>>, %arg11: memref<16x1280xf32, #tpu.memory_space<vmem>>, %arg12: memref<1280x64xf32, #tpu.memory_space<vmem>>, %arg13: memref<!tpu.dma_semaphore, #tpu.memory_space<semaphore_mem>>) attributes {dimension_semantics = [], scalar_prefetch = 0 : i64, scratch_operands = 3 : i64, tpu.core_type = #tpu.core_type<tc>} {
    tpu.enqueue_dma source(%arg2 : memref<1280x64xf32, #tpu.memory_space<any>>) target(%arg12 : memref<1280x64xf32, #tpu.memory_space<vmem>>) target_semaphore(%arg13 : memref<!tpu.dma_semaphore, #tpu.memory_space<semaphore_mem>>)
    %c0 = arith.constant 0 : index
    %c0_0 = arith.constant 0 : index
    %0 = vector.load %arg0[%c0, %c0_0] : memref<240x32xf32, #tpu.memory_space<vmem>>, vector<240x32xf32>
    %c0_1 = arith.constant 0 : index
    %c0_2 = arith.constant 0 : index
    %1 = vector.load %arg1[%c0_1, %c0_2] : memref<32x128xf32, #tpu.memory_space<vmem>>, vector<32x128xf32>
    %cst = arith.constant dense<0.000000e+00> : vector<240x128xf32>
    %2 = tpu.matmul %0, %1, %cst {dimension_numbers = #tpu.dot_dimension_numbers<[1], [0], [0], [1], [0, 0, 1, 1], [], []>} : vector<240x32xf32>, vector<32x128xf32>, vector<240x128xf32> -> vector<240x128xf32>
    %cst_3 = arith.constant 0.000000e+00 : f32
    %3 = vector.broadcast %cst_3 : f32 to vector<240x128xf32>
    %4 = arith.maximumf %2, %3 : vector<240x128xf32>
    %5 = vector.extract_strided_slice %4 {offsets = [0, 0], sizes = [8, 128], strides = [1, 1]} : vector<240x128xf32> to vector<8x128xf32>
    %6 = vector.extract_strided_slice %4 {offsets = [8, 0], sizes = [8, 128], strides = [1, 1]} : vector<240x128xf32> to vector<8x128xf32>
    %c64_i32 = arith.constant 64 : i32
    %7 = tpu.dynamic_rotate %6 by %c64_i32 dim 1 : vector<8x128xf32>, i32 -> vector<8x128xf32>
    %8 = arith.addf %5, %7 : vector<8x128xf32>
    %c0_4 = arith.constant 0 : index
    %c0_5 = arith.constant 0 : index
    %9 = vector.load %arg11[%c0_4, %c0_5] : memref<16x1280xf32, #tpu.memory_space<vmem>>, vector<8x128xf32>
    tpu.vector_store %arg11[%c0_4, %c0_5], %8 {strides = array<i32>} : memref<16x1280xf32, #tpu.memory_space<vmem>>, vector<8x128xf32>,
    %10 = vector.extract_strided_slice %4 {offsets = [16, 0], sizes = [8, 128], strides = [1, 1]} : vector<240x128xf32> to vector<8x128xf32>
    %11 = vector.extract_strided_slice %4 {offsets = [24, 0], sizes = [8, 128], strides = [1, 1]} : vector<240x128xf32> to vector<8x128xf32>
    %c64_i32_6 = arith.constant 64 : i32
    %12 = tpu.dynamic_rotate %11 by %c64_i32_6 dim 1 : vector<8x128xf32>, i32 -> vector<8x128xf32>
    %13 = arith.addf %10, %12 : vector<8x128xf32>
    %c0_7 = arith.constant 0 : index
    %c128 = arith.constant 128 : index
    %14 = vector.load %arg11[%c0_7, %c128] : memref<16x1280xf32, #tpu.memory_space<vmem>>, vector<8x128xf32>
    tpu.vector_store %arg11[%c0_7, %c128], %13 {strides = array<i32>} : memref<16x1280xf32, #tpu.memory_space<vmem>>, vector<8x128xf32>,
    %15 = vector.extract_strided_slice %4 {offsets = [32, 0], sizes = [8, 128], strides = [1, 1]} : vector<240x128xf32> to vector<8x128xf32>
    %16 = vector.extract_strided_slice %4 {offsets = [40, 0], sizes = [8, 128], strides = [1, 1]} : vector<240x128xf32> to vector<8x128xf32>
    %c64_i32_8 = arith.constant 64 : i32
    %17 = tpu.dynamic_rotate %16 by %c64_i32_8 dim 1 : vector<8x128xf32>, i32 -> vector<8x128xf32>
    %18 = arith.addf %15, %17 : vector<8x128xf32>
    %c0_9 = arith.constant 0 : index
    %c256 = arith.constant 256 : index
    %19 = vector.load %arg11[%c0_9, %c256] : memref<16x1280xf32, #tpu.memory_space<vmem>>, vector<8x128xf32>
    tpu.vector_store %arg11[%c0_9, %c256], %18 {strides = array<i32>} : memref<16x1280xf32, #tpu.memory_space<vmem>>, vector<8x128xf32>,
    %20 = vector.extract_strided_slice %4 {offsets = [48, 0], sizes = [8, 128], strides = [1, 1]} : vector<240x128xf32> to vector<8x128xf32>
    %21 = vector.extract_strided_slice %4 {offsets = [56, 0], sizes = [8, 128], strides = [1, 1]} : vector<240x128xf32> to vector<8x128xf32>
    %c64_i32_10 = arith.constant 64 : i32
    %22 = tpu.dynamic_rotate %21 by %c64_i32_10 dim 1 : vector<8x128xf32>, i32 -> vector<8x128xf32>
    %23 = arith.addf %20, %22 : vector<8x128xf32>
    %c0_11 = arith.constant 0 : index
    %c384 = arith.constant 384 : index
    %24 = vector.load %arg11[%c0_11, %c384] : memref<16x1280xf32, #tpu.memory_space<vmem>>, vector<8x128xf32>
    tpu.vector_store %arg11[%c0_11, %c384], %23 {strides = array<i32>} : memref<16x1280xf32, #tpu.memory_space<vmem>>, vector<8x128xf32>,
    %25 = vector.extract_strided_slice %4 {offsets = [64, 0], sizes = [8, 128], strides = [1, 1]} : vector<240x128xf32> to vector<8x128xf32>
    %26 = vector.extract_strided_slice %4 {offsets = [72, 0], sizes = [8, 128], strides = [1, 1]} : vector<240x128xf32> to vector<8x128xf32>
    %c64_i32_12 = arith.constant 64 : i32
    %27 = tpu.dynamic_rotate %26 by %c64_i32_12 dim 1 : vector<8x128xf32>, i32 -> vector<8x128xf32>
    %28 = arith.addf %25, %27 : vector<8x128xf32>
    %c0_13 = arith.constant 0 : index
    %c512 = arith.constant 512 : index
    %29 = vector.load %arg11[%c0_13, %c512] : memref<16x1280xf32, #tpu.memory_space<vmem>>, vector<8x128xf32>
    tpu.vector_store %arg11[%c0_13, %c512], %28 {strides = array<i32>} : memref<16x1280xf32, #tpu.memory_space<vmem>>, vector<8x128xf32>,
    %30 = vector.extract_strided_slice %4 {offsets = [80, 0], sizes = [8, 128], strides = [1, 1]} : vector<240x128xf32> to vector<8x128xf32>
    %31 = vector.extract_strided_slice %4 {offsets = [88, 0], sizes = [8, 128], strides = [1, 1]} : vector<240x128xf32> to vector<8x128xf32>
    %c64_i32_14 = arith.constant 64 : i32
    %32 = tpu.dynamic_rotate %31 by %c64_i32_14 dim 1 : vector<8x128xf32>, i32 -> vector<8x128xf32>
    %33 = arith.addf %30, %32 : vector<8x128xf32>
    %c0_15 = arith.constant 0 : index
    %c640 = arith.constant 640 : index
    %34 = vector.load %arg11[%c0_15, %c640] : memref<16x1280xf32, #tpu.memory_space<vmem>>, vector<8x128xf32>
    tpu.vector_store %arg11[%c0_15, %c640], %33 {strides = array<i32>} : memref<16x1280xf32, #tpu.memory_space<vmem>>, vector<8x128xf32>,
    %35 = vector.extract_strided_slice %4 {offsets = [96, 0], sizes = [8, 128], strides = [1, 1]} : vector<240x128xf32> to vector<8x128xf32>
    %36 = vector.extract_strided_slice %4 {offsets = [104, 0], sizes = [8, 128], strides = [1, 1]} : vector<240x128xf32> to vector<8x128xf32>
    %c64_i32_16 = arith.constant 64 : i32
    %37 = tpu.dynamic_rotate %36 by %c64_i32_16 dim 1 : vector<8x128xf32>, i32 -> vector<8x128xf32>
    %38 = arith.addf %35, %37 : vector<8x128xf32>
    %c0_17 = arith.constant 0 : index
    %c768 = arith.constant 768 : index
    %39 = vector.load %arg11[%c0_17, %c768] : memref<16x1280xf32, #tpu.memory_space<vmem>>, vector<8x128xf32>
    tpu.vector_store %arg11[%c0_17, %c768], %38 {strides = array<i32>} : memref<16x1280xf32, #tpu.memory_space<vmem>>, vector<8x128xf32>,
    %40 = vector.extract_strided_slice %4 {offsets = [112, 0], sizes = [8, 128], strides = [1, 1]} : vector<240x128xf32> to vector<8x128xf32>
    %41 = vector.extract_strided_slice %4 {offsets = [120, 0], sizes = [8, 128], strides = [1, 1]} : vector<240x128xf32> to vector<8x128xf32>
    %c64_i32_18 = arith.constant 64 : i32
    %42 = tpu.dynamic_rotate %41 by %c64_i32_18 dim 1 : vector<8x128xf32>, i32 -> vector<8x128xf32>
    %43 = arith.addf %40, %42 : vector<8x128xf32>
    %c0_19 = arith.constant 0 : index
    %c896 = arith.constant 896 : index
    %44 = vector.load %arg11[%c0_19, %c896] : memref<16x1280xf32, #tpu.memory_space<vmem>>, vector<8x128xf32>
    tpu.vector_store %arg11[%c0_19, %c896], %43 {strides = array<i32>} : memref<16x1280xf32, #tpu.memory_space<vmem>>, vector<8x128xf32>,
    %45 = vector.extract_strided_slice %4 {offsets = [128, 0], sizes = [8, 128], strides = [1, 1]} : vector<240x128xf32> to vector<8x128xf32>
    %46 = vector.extract_strided_slice %4 {offsets = [136, 0], sizes = [8, 128], strides = [1, 1]} : vector<240x128xf32> to vector<8x128xf32>
    %c64_i32_20 = arith.constant 64 : i32
    %47 = tpu.dynamic_rotate %46 by %c64_i32_20 dim 1 : vector<8x128xf32>, i32 -> vector<8x128xf32>
    %48 = arith.addf %45, %47 : vector<8x128xf32>
    %c0_21 = arith.constant 0 : index
    %c1024 = arith.constant 1024 : index
    %49 = vector.load %arg11[%c0_21, %c1024] : memref<16x1280xf32, #tpu.memory_space<vmem>>, vector<8x128xf32>
    tpu.vector_store %arg11[%c0_21, %c1024], %48 {strides = array<i32>} : memref<16x1280xf32, #tpu.memory_space<vmem>>, vector<8x128xf32>,
    %50 = vector.extract_strided_slice %4 {offsets = [144, 0], sizes = [8, 128], strides = [1, 1]} : vector<240x128xf32> to vector<8x128xf32>
    %51 = vector.extract_strided_slice %4 {offsets = [152, 0], sizes = [8, 128], strides = [1, 1]} : vector<240x128xf32> to vector<8x128xf32>
    %c64_i32_22 = arith.constant 64 : i32
    %52 = tpu.dynamic_rotate %51 by %c64_i32_22 dim 1 : vector<8x128xf32>, i32 -> vector<8x128xf32>
    %53 = arith.addf %50, %52 : vector<8x128xf32>
    %c0_23 = arith.constant 0 : index
    %c1152 = arith.constant 1152 : index
    %54 = vector.load %arg11[%c0_23, %c1152] : memref<16x1280xf32, #tpu.memory_space<vmem>>, vector<8x128xf32>
    tpu.vector_store %arg11[%c0_23, %c1152], %53 {strides = array<i32>} : memref<16x1280xf32, #tpu.memory_space<vmem>>, vector<8x128xf32>,
    %55 = vector.extract_strided_slice %4 {offsets = [80, 0], sizes = [8, 128], strides = [1, 1]} : vector<240x128xf32> to vector<8x128xf32>
    %56 = vector.extract_strided_slice %4 {offsets = [88, 0], sizes = [8, 128], strides = [1, 1]} : vector<240x128xf32> to vector<8x128xf32>
    %c64_i32_24 = arith.constant 64 : i32
    %57 = tpu.dynamic_rotate %56 by %c64_i32_24 dim 1 : vector<8x128xf32>, i32 -> vector<8x128xf32>
    %58 = arith.addf %55, %57 : vector<8x128xf32>
    %c8 = arith.constant 8 : index
    %c0_25 = arith.constant 0 : index
    %59 = vector.load %arg11[%c8, %c0_25] : memref<16x1280xf32, #tpu.memory_space<vmem>>, vector<8x128xf32>
    tpu.vector_store %arg11[%c8, %c0_25], %58 {strides = array<i32>} : memref<16x1280xf32, #tpu.memory_space<vmem>>, vector<8x128xf32>,
    %60 = vector.extract_strided_slice %4 {offsets = [96, 0], sizes = [8, 128], strides = [1, 1]} : vector<240x128xf32> to vector<8x128xf32>
    %61 = vector.extract_strided_slice %4 {offsets = [104, 0], sizes = [8, 128], strides = [1, 1]} : vector<240x128xf32> to vector<8x128xf32>
    %c64_i32_26 = arith.constant 64 : i32
    %62 = tpu.dynamic_rotate %61 by %c64_i32_26 dim 1 : vector<8x128xf32>, i32 -> vector<8x128xf32>
    %63 = arith.addf %60, %62 : vector<8x128xf32>
    %c8_27 = arith.constant 8 : index
    %c128_28 = arith.constant 128 : index
    %64 = vector.load %arg11[%c8_27, %c128_28] : memref<16x1280xf32, #tpu.memory_space<vmem>>, vector<8x128xf32>
    tpu.vector_store %arg11[%c8_27, %c128_28], %63 {strides = array<i32>} : memref<16x1280xf32, #tpu.memory_space<vmem>>, vector<8x128xf32>,
    %65 = vector.extract_strided_slice %4 {offsets = [112, 0], sizes = [8, 128], strides = [1, 1]} : vector<240x128xf32> to vector<8x128xf32>
    %66 = vector.extract_strided_slice %4 {offsets = [120, 0], sizes = [8, 128], strides = [1, 1]} : vector<240x128xf32> to vector<8x128xf32>
    %c64_i32_29 = arith.constant 64 : i32
    %67 = tpu.dynamic_rotate %66 by %c64_i32_29 dim 1 : vector<8x128xf32>, i32 -> vector<8x128xf32>
    %68 = arith.addf %65, %67 : vector<8x128xf32>
    %c8_30 = arith.constant 8 : index
    %c256_31 = arith.constant 256 : index
    %69 = vector.load %arg11[%c8_30, %c256_31] : memref<16x1280xf32, #tpu.memory_space<vmem>>, vector<8x128xf32>
    tpu.vector_store %arg11[%c8_30, %c256_31], %68 {strides = array<i32>} : memref<16x1280xf32, #tpu.memory_space<vmem>>, vector<8x128xf32>,
    %70 = vector.extract_strided_slice %4 {offsets = [128, 0], sizes = [8, 128], strides = [1, 1]} : vector<240x128xf32> to vector<8x128xf32>
    %71 = vector.extract_strided_slice %4 {offsets = [136, 0], sizes = [8, 128], strides = [1, 1]} : vector<240x128xf32> to vector<8x128xf32>
    %c64_i32_32 = arith.constant 64 : i32
    %72 = tpu.dynamic_rotate %71 by %c64_i32_32 dim 1 : vector<8x128xf32>, i32 -> vector<8x128xf32>
    %73 = arith.addf %70, %72 : vector<8x128xf32>
    %c8_33 = arith.constant 8 : index
    %c384_34 = arith.constant 384 : index
    %74 = vector.load %arg11[%c8_33, %c384_34] : memref<16x1280xf32, #tpu.memory_space<vmem>>, vector<8x128xf32>
    tpu.vector_store %arg11[%c8_33, %c384_34], %73 {strides = array<i32>} : memref<16x1280xf32, #tpu.memory_space<vmem>>, vector<8x128xf32>,
    %75 = vector.extract_strided_slice %4 {offsets = [144, 0], sizes = [8, 128], strides = [1, 1]} : vector<240x128xf32> to vector<8x128xf32>
    %76 = vector.extract_strided_slice %4 {offsets = [152, 0], sizes = [8, 128], strides = [1, 1]} : vector<240x128xf32> to vector<8x128xf32>
    %c64_i32_35 = arith.constant 64 : i32
    %77 = tpu.dynamic_rotate %76 by %c64_i32_35 dim 1 : vector<8x128xf32>, i32 -> vector<8x128xf32>
    %78 = arith.addf %75, %77 : vector<8x128xf32>
    %c8_36 = arith.constant 8 : index
    %c512_37 = arith.constant 512 : index
    %79 = vector.load %arg11[%c8_36, %c512_37] : memref<16x1280xf32, #tpu.memory_space<vmem>>, vector<8x128xf32>
    tpu.vector_store %arg11[%c8_36, %c512_37], %78 {strides = array<i32>} : memref<16x1280xf32, #tpu.memory_space<vmem>>, vector<8x128xf32>,
    %80 = vector.extract_strided_slice %4 {offsets = [160, 0], sizes = [8, 128], strides = [1, 1]} : vector<240x128xf32> to vector<8x128xf32>
    %81 = vector.extract_strided_slice %4 {offsets = [168, 0], sizes = [8, 128], strides = [1, 1]} : vector<240x128xf32> to vector<8x128xf32>
    %c64_i32_38 = arith.constant 64 : i32
    %82 = tpu.dynamic_rotate %81 by %c64_i32_38 dim 1 : vector<8x128xf32>, i32 -> vector<8x128xf32>
    %83 = arith.addf %80, %82 : vector<8x128xf32>
    %c8_39 = arith.constant 8 : index
    %c640_40 = arith.constant 640 : index
    %84 = vector.load %arg11[%c8_39, %c640_40] : memref<16x1280xf32, #tpu.memory_space<vmem>>, vector<8x128xf32>
    tpu.vector_store %arg11[%c8_39, %c640_40], %83 {strides = array<i32>} : memref<16x1280xf32, #tpu.memory_space<vmem>>, vector<8x128xf32>,
    %85 = vector.extract_strided_slice %4 {offsets = [176, 0], sizes = [8, 128], strides = [1, 1]} : vector<240x128xf32> to vector<8x128xf32>
    %86 = vector.extract_strided_slice %4 {offsets = [184, 0], sizes = [8, 128], strides = [1, 1]} : vector<240x128xf32> to vector<8x128xf32>
    %c64_i32_41 = arith.constant 64 : i32
    %87 = tpu.dynamic_rotate %86 by %c64_i32_41 dim 1 : vector<8x128xf32>, i32 -> vector<8x128xf32>
    %88 = arith.addf %85, %87 : vector<8x128xf32>
    %c8_42 = arith.constant 8 : index
    %c768_43 = arith.constant 768 : index
    %89 = vector.load %arg11[%c8_42, %c768_43] : memref<16x1280xf32, #tpu.memory_space<vmem>>, vector<8x128xf32>
    tpu.vector_store %arg11[%c8_42, %c768_43], %88 {strides = array<i32>} : memref<16x1280xf32, #tpu.memory_space<vmem>>, vector<8x128xf32>,
    %90 = vector.extract_strided_slice %4 {offsets = [192, 0], sizes = [8, 128], strides = [1, 1]} : vector<240x128xf32> to vector<8x128xf32>
    %91 = vector.extract_strided_slice %4 {offsets = [200, 0], sizes = [8, 128], strides = [1, 1]} : vector<240x128xf32> to vector<8x128xf32>
    %c64_i32_44 = arith.constant 64 : i32
    %92 = tpu.dynamic_rotate %91 by %c64_i32_44 dim 1 : vector<8x128xf32>, i32 -> vector<8x128xf32>
    %93 = arith.addf %90, %92 : vector<8x128xf32>
    %c8_45 = arith.constant 8 : index
    %c896_46 = arith.constant 896 : index
    %94 = vector.load %arg11[%c8_45, %c896_46] : memref<16x1280xf32, #tpu.memory_space<vmem>>, vector<8x128xf32>
    tpu.vector_store %arg11[%c8_45, %c896_46], %93 {strides = array<i32>} : memref<16x1280xf32, #tpu.memory_space<vmem>>, vector<8x128xf32>,
    %95 = vector.extract_strided_slice %4 {offsets = [208, 0], sizes = [8, 128], strides = [1, 1]} : vector<240x128xf32> to vector<8x128xf32>
    %96 = vector.extract_strided_slice %4 {offsets = [216, 0], sizes = [8, 128], strides = [1, 1]} : vector<240x128xf32> to vector<8x128xf32>
    %c64_i32_47 = arith.constant 64 : i32
    %97 = tpu.dynamic_rotate %96 by %c64_i32_47 dim 1 : vector<8x128xf32>, i32 -> vector<8x128xf32>
    %98 = arith.addf %95, %97 : vector<8x128xf32>
    %c8_48 = arith.constant 8 : index
    %c1024_49 = arith.constant 1024 : index
    %99 = vector.load %arg11[%c8_48, %c1024_49] : memref<16x1280xf32, #tpu.memory_space<vmem>>, vector<8x128xf32>
    tpu.vector_store %arg11[%c8_48, %c1024_49], %98 {strides = array<i32>} : memref<16x1280xf32, #tpu.memory_space<vmem>>, vector<8x128xf32>,
    %100 = vector.extract_strided_slice %4 {offsets = [224, 0], sizes = [8, 128], strides = [1, 1]} : vector<240x128xf32> to vector<8x128xf32>
    %101 = vector.extract_strided_slice %4 {offsets = [232, 0], sizes = [8, 128], strides = [1, 1]} : vector<240x128xf32> to vector<8x128xf32>
    %c64_i32_50 = arith.constant 64 : i32
    %102 = tpu.dynamic_rotate %101 by %c64_i32_50 dim 1 : vector<8x128xf32>, i32 -> vector<8x128xf32>
    %103 = arith.addf %100, %102 : vector<8x128xf32>
    %c8_51 = arith.constant 8 : index
    %c1152_52 = arith.constant 1152 : index
    %104 = vector.load %arg11[%c8_51, %c1152_52] : memref<16x1280xf32, #tpu.memory_space<vmem>>, vector<8x128xf32>
    tpu.vector_store %arg11[%c8_51, %c1152_52], %103 {strides = array<i32>} : memref<16x1280xf32, #tpu.memory_space<vmem>>, vector<8x128xf32>,
    tpu.wait_dma2 semaphore(%arg13 : memref<!tpu.dma_semaphore, #tpu.memory_space<semaphore_mem>>) src(%arg2 : memref<1280x64xf32, #tpu.memory_space<any>>) dst(%arg12 : memref<1280x64xf32, #tpu.memory_space<vmem>>)
    %c0_53 = arith.constant 0 : index
    %c0_54 = arith.constant 0 : index
    %105 = vector.load %arg11[%c0_53, %c0_54] : memref<16x1280xf32, #tpu.memory_space<vmem>>, vector<16x1280xf32>
    %c0_55 = arith.constant 0 : index
    %c0_56 = arith.constant 0 : index
    %106 = vector.load %arg12[%c0_55, %c0_56] : memref<1280x64xf32, #tpu.memory_space<vmem>>, vector<1280x64xf32>
    %cst_57 = arith.constant dense<0.000000e+00> : vector<16x64xf32>
    %107 = tpu.matmul %105, %106, %cst_57 {dimension_numbers = #tpu.dot_dimension_numbers<[1], [0], [0], [1], [0, 0, 1, 1], [], []>} : vector<16x1280xf32>, vector<1280x64xf32>, vector<16x64xf32> -> vector<16x64xf32>
    %cst_58 = arith.constant 0.000000e+00 : f32
    %108 = vector.broadcast %cst_58 : f32 to vector<16x64xf32>
    %109 = arith.maximumf %107, %108 : vector<16x64xf32>
    %110 = vector.extract_strided_slice %109 {offsets = [0, 0], sizes = [8, 64], strides = [1, 1]} : vector<16x64xf32> to vector<8x64xf32>
    %111 = vector.extract_strided_slice %109 {offsets = [8, 0], sizes = [8, 64], strides = [1, 1]} : vector<16x64xf32> to vector<8x64xf32>
    %112 = tpu.concatenate %110, %111 in 1 : vector<8x64xf32>, vector<8x64xf32> -> vector<8x128xf32>
    %c0_59 = arith.constant 0 : index
    %c0_60 = arith.constant 0 : index
    %113 = vector.load %arg3[%c0_59, %c0_60] : memref<128x64xf32, #tpu.memory_space<vmem>>, vector<128x64xf32>
    %cst_61 = arith.constant dense<0.000000e+00> : vector<8x64xf32>
    %114 = tpu.matmul %112, %113, %cst_61 {dimension_numbers = #tpu.dot_dimension_numbers<[1], [0], [0], [1], [0, 0, 1, 1], [], []>} : vector<8x128xf32>, vector<128x64xf32>, vector<8x64xf32> -> vector<8x64xf32>
    %cst_62 = arith.constant 0.000000e+00 : f32
    %115 = vector.broadcast %cst_62 : f32 to vector<8x64xf32>
    %116 = arith.maximumf %114, %115 : vector<8x64xf32>
    %c0_63 = arith.constant 0 : index
    %c0_64 = arith.constant 0 : index
    %117 = vector.load %arg4[%c0_63, %c0_64] : memref<64x64xf32, #tpu.memory_space<vmem>>, vector<64x64xf32>
    %cst_65 = arith.constant dense<0.000000e+00> : vector<8x64xf32>
    %118 = tpu.matmul %116, %117, %cst_65 {dimension_numbers = #tpu.dot_dimension_numbers<[1], [0], [0], [1], [0, 0, 1, 1], [], []>} : vector<8x64xf32>, vector<64x64xf32>, vector<8x64xf32> -> vector<8x64xf32>
    %c0_66 = arith.constant 0 : index
    %c0_67 = arith.constant 0 : index
    %119 = vector.load %arg10[%c0_66, %c0_67] : memref<8x64xf32, #tpu.memory_space<vmem>>, vector<8x64xf32>
    tpu.vector_store %arg10[%c0_66, %c0_67], %118 {strides = array<i32>} : memref<8x64xf32, #tpu.memory_space<vmem>>, vector<8x64xf32>,
    %cst_68 = arith.constant 0.000000e+00 : f32
    %120 = vector.broadcast %cst_68 : f32 to vector<8x1xf32>
    %c0_69 = arith.constant 0 : index
    %c0_70 = arith.constant 0 : index
    %121 = vector.load %arg9[%c0_69, %c0_70] : memref<8x1xf32, #tpu.memory_space<vmem>>, vector<8x1xf32>
    tpu.vector_store %arg9[%c0_69, %c0_70], %120 {strides = array<i32>} : memref<8x1xf32, #tpu.memory_space<vmem>>, vector<8x1xf32>,
    return
  }
}

</mosaic_0001>

<bundles_post_ra>
// kernel: net_forward.1
= control target key start
LH: loop header
LB: loop body
LE: loop exit
PB: predicated region body
PF: predicated region fallthrough
CT: control target
= control target key end

     0   :  { %19 = vsyncpa [#allocation9], 0  ;;  %s2598_s0 = inlined_call_operand.vmem [shape: f32[240,32], index: 0, kind: input, shape index: {}]   ;;  %s2599_s1 = inlined_call_operand.vmem [shape: f32[32,128], index: 1, kind: input, shape index: {}]   ;;  %s2600_s2 = inlined_call_operand.vmem [shape: f32[1280,64], index: 2, kind: input, shape index: {}]   ;;  %s2601_s3 = inlined_call_operand.vmem [shape: f32[128,64], index: 3, kind: input, shape index: {}]   ;;  %s2602_s4 = inlined_call_operand.vmem [shape: f32[64,64], index: 4, kind: input, shape index: {}]   ;;  %s2603_s5 = inlined_call_operand.vmem [shape: f32[64,1], index: 5, kind: input, shape index: {}]   ;;  %s2604_s6 = inlined_call_operand.<no memory space> [shape: f32[1], index: 6, kind: input, shape index: {}]   ;;  %s2605_s7 = inlined_call_operand.<no memory space> [shape: f32[1], index: 7, kind: input, shape index: {}]   ;;  %s2606_s8 = inlined_call_operand.<no memory space> [shape: f32[1], index: 8, kind: input, shape index: {}]   ;;  %s2607_s9 = inlined_call_operand.vmem [shape: f32[8,1], index: 9, kind: output, shape index: {0}]   ;;  %s2608_s10 = inlined_call_operand.hbm [shape: f32[8,64], index: 10, kind: output, shape index: {1}]  }
   0x1   :  { %v1353_v0 = vld [vmem:[%s2600_s2] sm:$0xff]  ;;  %v1358_v1 = vld [vmem:[%s2600_s2 + $0x8] sm:$0xff]  ;;  %v1363_v2 = vld [vmem:[%s2600_s2 + $0x10] sm:$0xff] }
   0x2   :  { %2609 = vst [vmem:[#allocation13_spill] sm:$0xff] %v1353_v0  ;;  %v1368_v3 = vld [vmem:[%s2600_s2 + $0x18] sm:$0xff]  ;;  %v1373_v4 = vld [vmem:[%s2600_s2 + $0x20] sm:$0xff]  ;;  %v1378_v5 = vld [vmem:[%s2600_s2 + $0x28] sm:$0xff] }
   0x3   :  { %2610 = vst [vmem:[#allocation14_spill] sm:$0xff] %v1358_v1  ;;  %v1383_v6 = vld [vmem:[%s2600_s2 + $0x30] sm:$0xff]  ;;  %v1388_v7 = vld [vmem:[%s2600_s2 + $0x38] sm:$0xff]  ;;  %v1393_v8 = vld [vmem:[%s2600_s2 + $0x40] sm:$0xff] }
   0x4   :  { %2611 = vst [vmem:[#allocation15_spill] sm:$0xff] %v1363_v2  ;;  %v1398_v9 = vld [vmem:[%s2600_s2 + $0x48] sm:$0xff]  ;;  %v1403_v10 = vld [vmem:[%s2600_s2 + $0x50] sm:$0xff]  ;;  %v1408_v11 = vld [vmem:[%s2600_s2 + $0x58] sm:$0xff] }
   0x5   :  { %2612 = vst [vmem:[#allocation16_spill] sm:$0xff] %v1368_v3  ;;  %v1413_v12 = vld [vmem:[%s2600_s2 + $0x60] sm:$0xff]  ;;  %v1418_v13 = vld [vmem:[%s2600_s2 + $0x68] sm:$0xff]  ;;  %v1423_v14 = vld [vmem:[%s2600_s2 + $0x70] sm:$0xff] }
   0x6   :  { %v1428_v15 = vld [vmem:[%s2600_s2 + $0x78] sm:$0xff]  ;;  %v1433_v16 = vld [vmem:[%s2600_s2 + $0x80] sm:$0xff]  ;;  %v1438_v17 = vld [vmem:[%s2600_s2 + $0x88] sm:$0xff] }
   0x7   :  { %2613 = vst [vmem:[#allocation17_spill] sm:$0xff] %v1433_v16  ;;  %v1443_v18 = vld [vmem:[%s2600_s2 + $0x90] sm:$0xff]  ;;  %v1448_v19 = vld [vmem:[%s2600_s2 + $0x98] sm:$0xff]  ;;  %v1453_v20 = vld [vmem:[%s2600_s2 + $0xa0] sm:$0xff] }
   0x8   :  { %2614 = vst [vmem:[#allocation18_spill] sm:$0xff] %v1438_v17  ;;  %v1458_v21 = vld [vmem:[%s2600_s2 + $0xa8] sm:$0xff]  ;;  %v1463_v22 = vld [vmem:[%s2600_s2 + $0xb0] sm:$0xff]  ;;  %v1468_v23 = vld [vmem:[%s2600_s2 + $0xb8] sm:$0xff] }
   0x9   :  { %2615 = vst [vmem:[#allocation19_spill] sm:$0xff] %v1443_v18  ;;  %v1473_v24 = vld [vmem:[%s2600_s2 + $0xc0] sm:$0xff]  ;;  %v1478_v25 = vld [vmem:[%s2600_s2 + $0xc8] sm:$0xff]  ;;  %v1483_v26 = vld [vmem:[%s2600_s2 + $0xd0] sm:$0xff] }
   0xa   :  { %2616 = vst [vmem:[#allocation20_spill] sm:$0xff] %v1448_v19  ;;  %v1488_v27 = vld [vmem:[%s2600_s2 + $0xd8] sm:$0xff]  ;;  %v1493_v28 = vld [vmem:[%s2600_s2 + $0xe0] sm:$0xff]  ;;  %v1498_v29 = vld [vmem:[%s2600_s2 + $0xe8] sm:$0xff] }
   0xb   :  { %v1503_v30 = vld [vmem:[%s2600_s2 + $0xf0] sm:$0xff]  ;;  %v1508_v31 = vld [vmem:[%s2600_s2 + $0xf8] sm:$0xff]  ;;  %v1513_v32 = vld [vmem:[%s2600_s2 + $0x100] sm:$0xff] }
   0xc   :  { %2617 = vst [vmem:[#allocation21_spill] sm:$0xff] %v1513_v32  ;;  %v1518_v33 = vld [vmem:[%s2600_s2 + $0x108] sm:$0xff]  ;;  %v1523_v34 = vld [vmem:[%s2600_s2 + $0x110] sm:$0xff]  ;;  %v1528_v35 = vld [vmem:[%s2600_s2 + $0x118] sm:$0xff] }
   0xd   :  { %2618 = vst [vmem:[#allocation22_spill] sm:$0xff] %v1518_v33  ;;  %v1533_v36 = vld [vmem:[%s2600_s2 + $0x120] sm:$0xff]  ;;  %v1538_v37 = vld [vmem:[%s2600_s2 + $0x128] sm:$0xff]  ;;  %v1543_v38 = vld [vmem:[%s2600_s2 + $0x130] sm:$0xff] }
   0xe   :  { %2619 = vst [vmem:[#allocation23_spill] sm:$0xff] %v1523_v34  ;;  %v1548_v39 = vld [vmem:[%s2600_s2 + $0x138] sm:$0xff]  ;;  %v1553_v40 = vld [vmem:[%s2600_s2 + $0x140] sm:$0xff]  ;;  %v1558_v41 = vld [vmem:[%s2600_s2 + $0x148] sm:$0xff] }
   0xf   :  { %2620 = vst [vmem:[#allocation24_spill] sm:$0xff] %v1528_v35  ;;  %v1563_v42 = vld [vmem:[%s2600_s2 + $0x150] sm:$0xff]  ;;  %v1568_v43 = vld [vmem:[%s2600_s2 + $0x158] sm:$0xff]  ;;  %v1573_v44 = vld [vmem:[%s2600_s2 + $0x160] sm:$0xff] }
  0x10   :  { %v1578_v45 = vld [vmem:[%s2600_s2 + $0x168] sm:$0xff]  ;;  %v1583_v46 = vld [vmem:[%s2600_s2 + $0x170] sm:$0xff]  ;;  %v1588_v47 = vld [vmem:[%s2600_s2 + $0x178] sm:$0xff] }
  0x11   :  { %v1593_v48 = vld [vmem:[%s2600_s2 + $0x180] sm:$0xff]  ;;  %v1598_v49 = vld [vmem:[%s2600_s2 + $0x188] sm:$0xff]  ;;  %v1603_v50 = vld [vmem:[%s2600_s2 + $0x190] sm:$0xff] }
  0x12   :  { %2621 = vst [vmem:[#allocation25_spill] sm:$0xff] %v1593_v48  ;;  %v1608_v51 = vld [vmem:[%s2600_s2 + $0x198] sm:$0xff]  ;;  %v1613_v52 = vld [vmem:[%s2600_s2 + $0x1a0] sm:$0xff]  ;;  %v1618_v53 = vld [vmem:[%s2600_s2 + $0x1a8] sm:$0xff] }
  0x13   :  { %2622 = vst [vmem:[#allocation26_spill] sm:$0xff] %v1598_v49  ;;  %v1623_v54 = vld [vmem:[%s2600_s2 + $0x1b0] sm:$0xff]  ;;  %v1628_v55 = vld [vmem:[%s2600_s2 + $0x1b8] sm:$0xff]  ;;  %v1633_v56 = vld [vmem:[%s2600_s2 + $0x1c0] sm:$0xff] }
  0x14   :  { %2623 = vst [vmem:[#allocation27_spill] sm:$0xff] %v1603_v50  ;;  %v1638_v57 = vld [vmem:[%s2600_s2 + $0x1c8] sm:$0xff]  ;;  %v1643_v58 = vld [vmem:[%s2600_s2 + $0x1d0] sm:$0xff]  ;;  %v1648_v59 = vld [vmem:[%s2600_s2 + $0x1d8] sm:$0xff] }
  0x15   :  { %2624 = vst [vmem:[#allocation28_spill] sm:$0xff] %v1608_v51  ;;  %v1653_v60 = vld [vmem:[%s2600_s2 + $0x1e0] sm:$0xff]  ;;  %v1658_v61 = vld [vmem:[%s2600_s2 + $0x1e8] sm:$0xff]  ;;  %v1663_v62 = vld [vmem:[%s2600_s2 + $0x1f0] sm:$0xff] }
  0x16   :  { %2625 = vst [vmem:[#allocation29_spill] sm:$0xff] %v1613_v52  ;;  %v1668_v63 = vld [vmem:[%s2600_s2 + $0x1f8] sm:$0xff]  ;;  %v1673_v48 = vld [vmem:[%s2600_s2 + $0x200] sm:$0xff]  ;;  %v1678_v49 = vld [vmem:[%s2600_s2 + $0x208] sm:$0xff] }
  0x17   :  { %2626 = vst [vmem:[#allocation30_spill] sm:$0xff] %v1618_v53  ;;  %v1683_v50 = vld [vmem:[%s2600_s2 + $0x210] sm:$0xff]  ;;  %v1688_v51 = vld [vmem:[%s2600_s2 + $0x218] sm:$0xff]  ;;  %v1693_v52 = vld [vmem:[%s2600_s2 + $0x220] sm:$0xff] }
  0x18   :  { %2627 = vst [vmem:[#allocation31_spill] sm:$0xff] %v1623_v54  ;;  %v1728_v53 = vld [vmem:[%s2600_s2 + $0x258] sm:$0xff]  ;;  %v1738_v54 = vld [vmem:[%s2600_s2 + $0x268] sm:$0xff] }
  0x19   :  { %2628 = vst [vmem:[#allocation32_spill] sm:$0xff] %v1628_v55  ;;  %v1748_v55 = vld [vmem:[%s2600_s2 + $0x278] sm:$0xff] }
  0x1a   :  { %2629 = vst [vmem:[#allocation33_spill] sm:$0xff] %v1633_v56  ;;  %v1758_v56 = vld [vmem:[%s2600_s2 + $0x288] sm:$0xff] }
  0x1b   :  { %2630 = vst [vmem:[#allocation34_spill] sm:$0xff] %v1638_v57  ;;  %v1768_v57 = vld [vmem:[%s2600_s2 + $0x298] sm:$0xff] }
  0x1c   :  { %2631 = vst [vmem:[#allocation35_spill] sm:$0xff] %v1643_v58  ;;  %v1838_v58 = vld [vmem:[%s2600_s2 + $0x308] sm:$0xff] }
  0x1d   :  { %2632 = vst [vmem:[#allocation36_spill] sm:$0xff] %v1648_v59  ;;  %v1853_v59 = vld [vmem:[%s2600_s2 + $0x320] sm:$0xff] }
  0x1e   :  { %2633 = vst [vmem:[#allocation37_spill] sm:$0xff] %v1653_v60 }
  0x1f   :  { %2634 = vst [vmem:[#allocation38_spill] sm:$0xff] %v1658_v61 }
  0x20   :  { %2635 = vst [vmem:[#allocation39_spill] sm:$0xff] %v1663_v62 }
  0x21   :  { %2636 = vst [vmem:[#allocation40_spill] sm:$0xff] %v1668_v63 }
  0x22   :  { %2637 = vst [vmem:[#allocation41_spill] sm:$0xff] %v1673_v48  ;;  %v1698_v48 = vld [vmem:[%s2600_s2 + $0x228] sm:$0xff] }
  0x23   :  { %2638 = vst [vmem:[#allocation42_spill] sm:$0xff] %v1678_v49  ;;  %v1703_v49 = vld [vmem:[%s2600_s2 + $0x230] sm:$0xff] }
  0x24   :  { %2639 = vst [vmem:[#allocation43_spill] sm:$0xff] %v1683_v50  ;;  %v1708_v50 = vld [vmem:[%s2600_s2 + $0x238] sm:$0xff] }
  0x25   :  { %2640 = vst [vmem:[#allocation44_spill] sm:$0xff] %v1688_v51  ;;  %v1713_v51 = vld [vmem:[%s2600_s2 + $0x240] sm:$0xff] }
  0x26   :  { %2641 = vst [vmem:[#allocation45_spill] sm:$0xff] %v1693_v52  ;;  %v1718_v52 = vld [vmem:[%s2600_s2 + $0x248] sm:$0xff] }
  0x27   :  { %2642 = vst [vmem:[#allocation46_spill] sm:$0xff] %v1698_v48  ;;  %v1723_v48 = vld [vmem:[%s2600_s2 + $0x250] sm:$0xff] }
  0x28   :  { %2643 = vst [vmem:[#allocation47_spill] sm:$0xff] %v1703_v49  ;;  %v1733_v49 = vld [vmem:[%s2600_s2 + $0x260] sm:$0xff] }
  0x29   :  { %2644 = vst [vmem:[#allocation48_spill] sm:$0xff] %v1708_v50  ;;  %v1743_v50 = vld [vmem:[%s2600_s2 + $0x270] sm:$0xff] }
  0x2a   :  { %2645 = vst [vmem:[#allocation49_spill] sm:$0xff] %v1713_v51  ;;  %v1753_v51 = vld [vmem:[%s2600_s2 + $0x280] sm:$0xff] }
  0x2b   :  { %2646 = vst [vmem:[#allocation50_spill] sm:$0xff] %v1718_v52  ;;  %v1763_v52 = vld [vmem:[%s2600_s2 + $0x290] sm:$0xff] }
  0x2c   :  { %2647 = vst [vmem:[#allocation51_spill] sm:$0xff] %v1723_v48  ;;  %v1773_v48 = vld [vmem:[%s2600_s2 + $0x2a0] sm:$0xff] }
  0x2d   :  { %2648 = vst [vmem:[#allocation52_spill] sm:$0xff] %v1728_v53  ;;  %v1848_v53 = vld [vmem:[%s2600_s2 + $0x318] sm:$0xff] }
  0x2e   :  { %2649 = vst [vmem:[#allocation53_spill] sm:$0xff] %v1733_v49 }
  0x2f   :  { %2650 = vst [vmem:[#allocation54_spill] sm:$0xff] %v1738_v54 }
  0x30   :  { %2651 = vst [vmem:[#allocation55_spill] sm:$0xff] %v1743_v50 }
  0x31   :  { %2652 = vst [vmem:[#allocation56_spill] sm:$0xff] %v1748_v55 }
  0x32   :  { %2653 = vst [vmem:[#allocation57_spill] sm:$0xff] %v1753_v51  ;;  %v1778_v51 = vld [vmem:[%s2600_s2 + $0x2a8] sm:$0xff] }
  0x33   :  { %2654 = vst [vmem:[#allocation58_spill] sm:$0xff] %v1758_v56  ;;  %v1783_v56 = vld [vmem:[%s2600_s2 + $0x2b0] sm:$0xff] }
  0x34   :  { %2655 = vst [vmem:[#allocation59_spill] sm:$0xff] %v1763_v52  ;;  %v1788_v52 = vld [vmem:[%s2600_s2 + $0x2b8] sm:$0xff] }
  0x35   :  { %2656 = vst [vmem:[#allocation60_spill] sm:$0xff] %v1768_v57  ;;  %v1793_v57 = vld [vmem:[%s2600_s2 + $0x2c0] sm:$0xff] }
  0x36   :  { %2657 = vst [vmem:[#allocation61_spill] sm:$0xff] %v1773_v48  ;;  %v1798_v48 = vld [vmem:[%s2600_s2 + $0x2c8] sm:$0xff] }
  0x37   :  { %2658 = vst [vmem:[#allocation62_spill] sm:$0xff] %v1778_v51  ;;  %v1803_v51 = vld [vmem:[%s2600_s2 + $0x2d0] sm:$0xff] }
  0x38   :  { %2659 = vst [vmem:[#allocation63_spill] sm:$0xff] %v1783_v56  ;;  %v1808_v56 = vld [vmem:[%s2600_s2 + $0x2d8] sm:$0xff] }
  0x39   :  { %2660 = vst [vmem:[#allocation64_spill] sm:$0xff] %v1788_v52  ;;  %v1813_v52 = vld [vmem:[%s2600_s2 + $0x2e0] sm:$0xff] }
  0x3a   :  { %2661 = vst [vmem:[#allocation65_spill] sm:$0xff] %v1793_v57  ;;  %v1818_v57 = vld [vmem:[%s2600_s2 + $0x2e8] sm:$0xff] }
  0x3b   :  { %2662 = vst [vmem:[#allocation66_spill] sm:$0xff] %v1798_v48  ;;  %v1823_v48 = vld [vmem:[%s2600_s2 + $0x2f0] sm:$0xff] }
  0x3c   :  { %2663 = vst [vmem:[#allocation67_spill] sm:$0xff] %v1803_v51  ;;  %v1828_v51 = vld [vmem:[%s2600_s2 + $0x2f8] sm:$0xff] }
  0x3d   :  { %2664 = vst [vmem:[#allocation68_spill] sm:$0xff] %v1808_v56  ;;  %v1833_v56 = vld [vmem:[%s2600_s2 + $0x300] sm:$0xff] }
  0x3e   :  { %2665 = vst [vmem:[#allocation69_spill] sm:$0xff] %v1813_v52  ;;  %v1843_v52 = vld [vmem:[%s2600_s2 + $0x310] sm:$0xff] }
  0x3f   :  { %2666 = vst [vmem:[#allocation70_spill] sm:$0xff] %v1818_v57 }
  0x40   :  { %2667 = vst [vmem:[#allocation71_spill] sm:$0xff] %v1823_v48 }
  0x41   :  { %2668 = vst [vmem:[#allocation72_spill] sm:$0xff] %v1828_v51 }
  0x42   :  { %2669 = vst [vmem:[#allocation73_spill] sm:$0xff] %v1833_v56  ;;  %v1858_v56 = vld [vmem:[%s2600_s2 + $0x328] sm:$0xff] }
  0x43   :  { %2670 = vst [vmem:[#allocation74_spill] sm:$0xff] %v1838_v58  ;;  %v1863_v58 = vld [vmem:[%s2600_s2 + $0x330] sm:$0xff] }
  0x44   :  { %2671 = vst [vmem:[#allocation75_spill] sm:$0xff] %v1843_v52  ;;  %v1868_v52 = vld [vmem:[%s2600_s2 + $0x338] sm:$0xff] }
  0x45   :  { %2672 = vst [vmem:[#allocation76_spill] sm:$0xff] %v1848_v53  ;;  %v1873_v53 = vld [vmem:[%s2600_s2 + $0x340] sm:$0xff] }
  0x46   :  { %2673 = vst [vmem:[#allocation77_spill] sm:$0xff] %v1853_v59  ;;  %v1878_v59 = vld [vmem:[%s2600_s2 + $0x348] sm:$0xff] }
  0x47   :  { %2674 = vst [vmem:[#allocation78_spill] sm:$0xff] %v1858_v56  ;;  %v1883_v56 = vld [vmem:[%s2600_s2 + $0x350] sm:$0xff] }
  0x48   :  { %2675 = vst [vmem:[#allocation79_spill] sm:$0xff] %v1863_v58  ;;  %v1888_v58 = vld [vmem:[%s2600_s2 + $0x358] sm:$0xff] }
  0x49   :  { %2676 = vst [vmem:[#allocation80_spill] sm:$0xff] %v1868_v52  ;;  %v1893_v52 = vld [vmem:[%s2600_s2 + $0x360] sm:$0xff] }
  0x4a   :  { %2677 = vst [vmem:[#allocation81_spill] sm:$0xff] %v1873_v53  ;;  %v1898_v53 = vld [vmem:[%s2600_s2 + $0x368] sm:$0xff] }
  0x4b   :  { %2678 = vst [vmem:[#allocation82_spill] sm:$0xff] %v1878_v59  ;;  %v1903_v59 = vld [vmem:[%s2600_s2 + $0x370] sm:$0xff] }
  0x4c   :  { %2679 = vst [vmem:[#allocation83_spill] sm:$0xff] %v1883_v56  ;;  %v1908_v56 = vld [vmem:[%s2600_s2 + $0x378] sm:$0xff] }
  0x4d   :  { %2680 = vst [vmem:[#allocation84_spill] sm:$0xff] %v1888_v58  ;;  %v1913_v58 = vld [vmem:[%s2600_s2 + $0x380] sm:$0xff] }
  0x4e   :  { %2681 = vst [vmem:[#allocation85_spill] sm:$0xff] %v1893_v52  ;;  %v1918_v52 = vld [vmem:[%s2600_s2 + $0x388] sm:$0xff] }
  0x4f   :  { %2682 = vst [vmem:[#allocation86_spill] sm:$0xff] %v1898_v53  ;;  %v1923_v53 = vld [vmem:[%s2600_s2 + $0x390] sm:$0xff] }
  0x50   :  { %2683 = vst [vmem:[#allocation87_spill] sm:$0xff] %v1903_v59  ;;  %v1928_v59 = vld [vmem:[%s2600_s2 + $0x398] sm:$0xff] }
  0x51   :  { %2684 = vst [vmem:[#allocation88_spill] sm:$0xff] %v1908_v56  ;;  %v1933_v56 = vld [vmem:[%s2600_s2 + $0x3a0] sm:$0xff] }
  0x52   :  { %2685 = vst [vmem:[#allocation89_spill] sm:$0xff] %v1913_v58  ;;  %v1938_v58 = vld [vmem:[%s2600_s2 + $0x3a8] sm:$0xff] }
  0x53   :  { %2686 = vst [vmem:[#allocation90_spill] sm:$0xff] %v1918_v52  ;;  %v1943_v52 = vld [vmem:[%s2600_s2 + $0x3b0] sm:$0xff] }
  0x54   :  { %2687 = vst [vmem:[#allocation91_spill] sm:$0xff] %v1923_v53  ;;  %v1948_v53 = vld [vmem:[%s2600_s2 + $0x3b8] sm:$0xff] }
  0x55   :  { %2688 = vst [vmem:[#allocation92_spill] sm:$0xff] %v1928_v59  ;;  %v1953_v59 = vld [vmem:[%s2600_s2 + $0x3c0] sm:$0xff] }
  0x56   :  { %2689 = vst [vmem:[#allocation93_spill] sm:$0xff] %v1933_v56  ;;  %v1958_v56 = vld [vmem:[%s2600_s2 + $0x3c8] sm:$0xff] }
  0x57   :  { %2690 = vst [vmem:[#allocation94_spill] sm:$0xff] %v1938_v58  ;;  %v1963_v58 = vld [vmem:[%s2600_s2 + $0x3d0] sm:$0xff] }
  0x58   :  { %2691 = vst [vmem:[#allocation95_spill] sm:$0xff] %v1943_v52  ;;  %v1968_v52 = vld [vmem:[%s2600_s2 + $0x3d8] sm:$0xff] }
  0x59   :  { %2692 = vst [vmem:[#allocation96_spill] sm:$0xff] %v1948_v53  ;;  %v1973_v53 = vld [vmem:[%s2600_s2 + $0x3e0] sm:$0xff] }
  0x5a   :  { %2693 = vst [vmem:[#allocation97_spill] sm:$0xff] %v1953_v59  ;;  %v1978_v59 = vld [vmem:[%s2600_s2 + $0x3e8] sm:$0xff] }
  0x5b   :  { %2694 = vst [vmem:[#allocation98_spill] sm:$0xff] %v1958_v56  ;;  %v1983_v56 = vld [vmem:[%s2600_s2 + $0x3f0] sm:$0xff] }
  0x5c   :  { %2695 = vst [vmem:[#allocation99_spill] sm:$0xff] %v1963_v58  ;;  %v1988_v58 = vld [vmem:[%s2600_s2 + $0x3f8] sm:$0xff] }
  0x5d   :  { %2696 = vst [vmem:[#allocation100_spill] sm:$0xff] %v1968_v52  ;;  %v1993_v52 = vld [vmem:[%s2600_s2 + $0x400] sm:$0xff] }
  0x5e   :  { %2697 = vst [vmem:[#allocation101_spill] sm:$0xff] %v1973_v53  ;;  %v1998_v53 = vld [vmem:[%s2600_s2 + $0x408] sm:$0xff] }
  0x5f   :  { %2698 = vst [vmem:[#allocation102_spill] sm:$0xff] %v1978_v59  ;;  %v2003_v59 = vld [vmem:[%s2600_s2 + $0x410] sm:$0xff] }
  0x60   :  { %2699 = vst [vmem:[#allocation103_spill] sm:$0xff] %v1983_v56  ;;  %v2008_v56 = vld [vmem:[%s2600_s2 + $0x418] sm:$0xff] }
  0x61   :  { %2700 = vst [vmem:[#allocation104_spill] sm:$0xff] %v1988_v58  ;;  %v2013_v58 = vld [vmem:[%s2600_s2 + $0x420] sm:$0xff] }
  0x62   :  { %2701 = vst [vmem:[#allocation105_spill] sm:$0xff] %v1993_v52  ;;  %v2018_v52 = vld [vmem:[%s2600_s2 + $0x428] sm:$0xff] }
  0x63   :  { %2702 = vst [vmem:[#allocation106_spill] sm:$0xff] %v1998_v53  ;;  %v2023_v53 = vld [vmem:[%s2600_s2 + $0x430] sm:$0xff] }
  0x64   :  { %2703 = vst [vmem:[#allocation107_spill] sm:$0xff] %v2003_v59  ;;  %v2028_v59 = vld [vmem:[%s2600_s2 + $0x438] sm:$0xff] }
  0x65   :  { %2704 = vst [vmem:[#allocation108_spill] sm:$0xff] %v2008_v56  ;;  %v2033_v56 = vld [vmem:[%s2600_s2 + $0x440] sm:$0xff] }
  0x66   :  { %2705 = vst [vmem:[#allocation109_spill] sm:$0xff] %v2013_v58  ;;  %v2038_v58 = vld [vmem:[%s2600_s2 + $0x448] sm:$0xff] }
  0x67   :  { %2706 = vst [vmem:[#allocation110_spill] sm:$0xff] %v2018_v52  ;;  %v2043_v52 = vld [vmem:[%s2600_s2 + $0x450] sm:$0xff] }
  0x68   :  { %2707 = vst [vmem:[#allocation111_spill] sm:$0xff] %v2023_v53  ;;  %v2048_v53 = vld [vmem:[%s2600_s2 + $0x458] sm:$0xff] }
  0x69   :  { %2708 = vst [vmem:[#allocation112_spill] sm:$0xff] %v2028_v59  ;;  %v2053_v59 = vld [vmem:[%s2600_s2 + $0x460] sm:$0xff] }
  0x6a   :  { %2709 = vst [vmem:[#allocation113_spill] sm:$0xff] %v2033_v56  ;;  %v2058_v56 = vld [vmem:[%s2600_s2 + $0x468] sm:$0xff] }
  0x6b   :  { %2710 = vst [vmem:[#allocation114_spill] sm:$0xff] %v2038_v58  ;;  %v2063_v58 = vld [vmem:[%s2600_s2 + $0x470] sm:$0xff] }
  0x6c   :  { %2711 = vst [vmem:[#allocation115_spill] sm:$0xff] %v2043_v52  ;;  %v2068_v52 = vld [vmem:[%s2600_s2 + $0x478] sm:$0xff] }
  0x6d   :  { %2712 = vst [vmem:[#allocation116_spill] sm:$0xff] %v2048_v53  ;;  %v2073_v53 = vld [vmem:[%s2600_s2 + $0x480] sm:$0xff] }
  0x6e   :  { %2713 = vst [vmem:[#allocation117_spill] sm:$0xff] %v2053_v59  ;;  %v2078_v59 = vld [vmem:[%s2600_s2 + $0x488] sm:$0xff] }
  0x6f   :  { %2714 = vst [vmem:[#allocation118_spill] sm:$0xff] %v2058_v56  ;;  %v2083_v56 = vld [vmem:[%s2600_s2 + $0x490] sm:$0xff] }
  0x70   :  { %2715 = vst [vmem:[#allocation119_spill] sm:$0xff] %v2063_v58  ;;  %v2088_v58 = vld [vmem:[%s2600_s2 + $0x498] sm:$0xff] }
  0x71   :  { %2716 = vst [vmem:[#allocation120_spill] sm:$0xff] %v2068_v52  ;;  %v2093_v52 = vld [vmem:[%s2600_s2 + $0x4a0] sm:$0xff] }
  0x72   :  { %2717 = vst [vmem:[#allocation121_spill] sm:$0xff] %v2073_v53  ;;  %v2098_v53 = vld [vmem:[%s2600_s2 + $0x4a8] sm:$0xff] }
  0x73   :  { %2718 = vst [vmem:[#allocation122_spill] sm:$0xff] %v2078_v59  ;;  %v2103_v59 = vld [vmem:[%s2600_s2 + $0x4b0] sm:$0xff] }
  0x74   :  { %2719 = vst [vmem:[#allocation123_spill] sm:$0xff] %v2083_v56  ;;  %v2108_v56 = vld [vmem:[%s2600_s2 + $0x4b8] sm:$0xff] }
  0x75   :  { %2720 = vst [vmem:[#allocation124_spill] sm:$0xff] %v2088_v58  ;;  %v2113_v58 = vld [vmem:[%s2600_s2 + $0x4c0] sm:$0xff] }
  0x76   :  { %2721 = vst [vmem:[#allocation125_spill] sm:$0xff] %v2093_v52  ;;  %v2118_v52 = vld [vmem:[%s2600_s2 + $0x4c8] sm:$0xff] }
  0x77   :  { %2722 = vst [vmem:[#allocation126_spill] sm:$0xff] %v2098_v53  ;;  %v2123_v53 = vld [vmem:[%s2600_s2 + $0x4d0] sm:$0xff] }
  0x78   :  { %2723 = vst [vmem:[#allocation127_spill] sm:$0xff] %v2103_v59  ;;  %v2128_v59 = vld [vmem:[%s2600_s2 + $0x4d8] sm:$0xff] }
  0x79   :  { %2724 = vst [vmem:[#allocation128_spill] sm:$0xff] %v2108_v56  ;;  %v2133_v56 = vld [vmem:[%s2600_s2 + $0x4e0] sm:$0xff] }
  0x7a   :  { %2725 = vst [vmem:[#allocation129_spill] sm:$0xff] %v2113_v58  ;;  %v2138_v58 = vld [vmem:[%s2600_s2 + $0x4e8] sm:$0xff] }
  0x7b   :  { %2726 = vst [vmem:[#allocation130_spill] sm:$0xff] %v2118_v52  ;;  %v2143_v52 = vld [vmem:[%s2600_s2 + $0x4f0] sm:$0xff] }
  0x7c   :  { %2727 = vst [vmem:[#allocation131_spill] sm:$0xff] %v2123_v53  ;;  %v2148_v53 = vld [vmem:[%s2600_s2 + $0x4f8] sm:$0xff] }
  0x7d   :  { %2728 = vst [vmem:[#allocation132_spill] sm:$0xff] %v2128_v59 }
  0x7e   :  { %2729 = vst [vmem:[#allocation133_spill] sm:$0xff] %v2133_v56 }
  0x7f   :  { %2730 = vst [vmem:[#allocation134_spill] sm:$0xff] %v2138_v58 }
  0x80   :  { %2731 = vst [vmem:[#allocation135_spill] sm:$0xff] %v2143_v52 }
  0x81   :  { %2732 = vst [vmem:[#allocation136_spill] sm:$0xff] %v2148_v53 }
  0x82   :  { %371 = vsyncadd [#allocation4], 20480  ;;  %v405_v59 = vld [vmem:[%s2599_s1 + $0x18] sm:$0xff]  ;;  %v404_v56 = vld [vmem:[%s2599_s1 + $0x10] sm:$0xff]  ;;  %vm406_vm0 = vcmask 261120   ;;  %882 = vmatpush.msra.mxu1 %v1428_v15 }
  0x83   :  { %509 = vmatpush.msra.mxu0 %v405_v59  ;;  %1253 = vmatpush.msra.mxu2 %v405_v59  ;;  %v403_v58 = vld [vmem:[%s2599_s1 + $0x8] sm:$0xff]  ;;  %v402_v52 = vld [vmem:[%s2599_s1] sm:$0xff]  ;;  %v391_v57 = vld [vmem:[%s2598_s0 + $0x98] sm:$0xff]  ;;  %s1292_s1 = smov 64  }
  0x84   :  { %1254 = vmatpush.msra.mxu3 %v405_v59  ;;  %v372_v53 = vld [vmem:[%s2598_s0] sm:$0xff] }
  0x85   :  { %510 = vmatpush.msra.mxu0 %v404_v56  ;;  %1255 = vmatpush.msra.mxu2 %v404_v56  ;;  %v392_v59 = vld [vmem:[%s2598_s0 + $0xa0] sm:$0xff] }
  0x86   :  { %1256 = vmatpush.msra.mxu3 %v404_v56  ;;  %v373_v56 = vld [vmem:[%s2598_s0 + $0x8] sm:$0xff] }
  0x87   :  { %511 = vmatpush.msra.mxu0 %v403_v58  ;;  %1257 = vmatpush.msra.mxu2 %v403_v58 }
  0x88   :  { %1258 = vmatpush.msra.mxu3 %v403_v58  ;;  %v374_v58 = vld [vmem:[%s2598_s0 + $0x10] sm:$0xff] }
  0x89   :  { %512 = vmatpush.msra.mxu0 %v402_v52  ;;  %1259 = vmatpush.msra.mxu2 %v402_v52 }
  0x8a   :  { %1221 = vmatmul.msk.f32.vlgmr.msra.gmra.mxu0 %vm406_vm0, %v372_v53  ;;  %1240 = vmatmul.msk.f32.vlgmr.msra.gmra.mxu2 %vm406_vm0, %v391_v57  ;;  %v375_v53 = vld [vmem:[%s2598_s0 + $0x18] sm:$0xff] }
  0x8b   :  { %1260 = vmatpush.msra.mxu3 %v402_v52  ;;  %v393_v52 = vld [vmem:[%s2598_s0 + $0xa8] sm:$0xff]  ;;  %v395_v57 = vld [vmem:[%s2598_s0 + $0xb8] sm:$0xff]  ;;  %905 = vmatpush.msrb.mxu2 %v1508_v31 }
  0x8c   :  { %1244 = vmatmul.msk.f32.vlgmr.msra.gmra.mxu3 %vm406_vm0, %v395_v57  ;;  %v396_v57 = vld [vmem:[%s2598_s0 + $0xc0] sm:$0xff] }
  0x92   :  { %1222 = vmatmul.msk.f32.gmra.mxu0 %vm406_vm0, %v373_v56  ;;  %1241 = vmatmul.msk.f32.gmra.mxu2 %vm406_vm0, %v392_v59  ;;  %v376_v56 = vld [vmem:[%s2598_s0 + $0x20] sm:$0xff]  ;;  %v377_v59 = vld [vmem:[%s2598_s0 + $0x28] sm:$0xff] }
  0x94   :  { %1245 = vmatmul.msk.f32.gmra.mxu3 %vm406_vm0, %v396_v57  ;;  %v399_v57 = vld [vmem:[%s2598_s0 + $0xd8] sm:$0xff] }
  0x9a   :  { %1223 = vmatmul.msk.f32.gmra.mxu0 %vm406_vm0, %v374_v58  ;;  %1242 = vmatmul.msk.f32.gmra.mxu2 %vm406_vm0, %v393_v52  ;;  %v378_v58 = vld [vmem:[%s2598_s0 + $0x30] sm:$0xff]  ;;  %v379_v52 = vld [vmem:[%s2598_s0 + $0x38] sm:$0xff] }
  0xa2   :  { %1224 = vmatmul.msk.f32.gmra.mxu0 %vm406_vm0, %v375_v53  ;;  %v380_v53 = vld [vmem:[%s2598_s0 + $0x40] sm:$0xff] }
  0xaa   :  { %1225 = vmatmul.msk.f32.gmra.mxu0 %vm406_vm0, %v376_v56  ;;  %v381_v56 = vld [vmem:[%s2598_s0 + $0x48] sm:$0xff] }
  0xb2   :  { %1226 = vmatmul.msk.f32.gmra.mxu0 %vm406_vm0, %v377_v59  ;;  %v397_v59 = vld [vmem:[%s2598_s0 + $0xc8] sm:$0xff] }
  0xb3   :  { %1246 = vmatmul.msk.f32.gmra.mxu3 %vm406_vm0, %v397_v59  ;;  %v400_v59 = vld [vmem:[%s2598_s0 + $0xe0] sm:$0xff] }
  0xba   :  { %1227 = vmatmul.msk.f32.gmra.mxu0 %vm406_vm0, %v378_v58  ;;  %v382_v58 = vld [vmem:[%s2598_s0 + $0x50] sm:$0xff] }
  0xc2   :  { %1228 = vmatmul.msk.f32.gmra.mxu0 %vm406_vm0, %v379_v52  ;;  %v398_v52 = vld [vmem:[%s2598_s0 + $0xd0] sm:$0xff] }
  0xc3   :  { %1247 = vmatmul.msk.f32.gmra.mxu3 %vm406_vm0, %v398_v52  ;;  %v401_v52 = vld [vmem:[%s2598_s0 + $0xe8] sm:$0xff] }
  0xca   :  { %1229 = vmatmul.msk.f32.gmra.mxu0 %vm406_vm0, %v380_v53  ;;  %v383_v53 = vld [vmem:[%s2598_s0 + $0x58] sm:$0xff] }
  0xcb   :  { %1248 = vmatmul.msk.f32.gmra.mxu3 %vm406_vm0, %v399_v57  ;;  %v387_v57 = vld [vmem:[%s2598_s0 + $0x78] sm:$0xff] }
  0xd2   :  { %1230 = vmatmul.msk.f32.gmra.mxu0 %vm406_vm0, %v381_v56  ;;  %v384_v56 = vld [vmem:[%s2598_s0 + $0x60] sm:$0xff] }
  0xd3   :  { %1249 = vmatmul.msk.f32.gmra.mxu3 %vm406_vm0, %v400_v59  ;;  %v388_v59 = vld [vmem:[%s2598_s0 + $0x80] sm:$0xff] }
  0xda   :  { %1231 = vmatmul.msk.f32.gmra.mxu0 %vm406_vm0, %v382_v58  ;;  %v385_v58 = vld [vmem:[%s2598_s0 + $0x68] sm:$0xff] }
  0xdb   :  { %1250 = vmatmul.msk.f32.gmra.mxu3 %vm406_vm0, %v401_v52 }
  0xe2   :  { %1232 = vmatmul.msk.f32.gmra.mxu0 %vm406_vm0, %v383_v53  ;;  %v386_v53 = vld [vmem:[%s2598_s0 + $0x70] sm:$0xff] }
  0xea   :  { %1233 = vmatmul.msk.f32.gmra.mxu0 %vm406_vm0, %v384_v56 }
  0xf2   :  { %1234 = vmatmul.msk.f32.gmra.mxu0 %vm406_vm0, %v385_v58 }
  0xfa   :  { %1235 = vmatmul.msk.f32.gmra.mxu0 %vm406_vm0, %v386_v53  ;;  %v389_v53 = vld [vmem:[%s2598_s0 + $0x88] sm:$0xff] }
 0x102   :  { %1236 = vmatmul.msk.f32.gmra.mxu0 %vm406_vm0, %v387_v57 }
 0x107   :  { %v2266_v56 = vpop.f32.mrf.mxu0 }
 0x108   :  { %v604_v1 = vmax.f32 %v2266_v56, 0.0 }
 0x10a   :  { %1237 = vmatmul.msk.f32.gmra.mxu0 %vm406_vm0, %v388_v59 }
 0x10d   :  { %v571_v58 = vpop.f32.mrf.mxu2 }
 0x10e   :  { %v623_v52 = vmax.f32 %v571_v58, 0.0  ;;  %v394_v58 = vld [vmem:[%s2598_s0 + $0xb0] sm:$0xff] }
 0x10f   :  { %v517_v49 = vpop.f32.mrf.mxu0  ;;  %1243 = vmatmul.msk.f32.gmra.mxu2 %vm406_vm0, %v394_v58 }
 0x110   :  { %670 = vrot.lane.b32.xlu0 %v623_v52, %s1292_s1  ;;  %v605_v60 = vmax.f32 %v517_v49, 0.0  ;;  %v583_v49 = vpop.f32.mrf.mxu3 }
 0x112   :  { %1238 = vmatmul.msk.f32.gmra.mxu0 %vm406_vm0, %v389_v53  ;;  %v627_v53 = vmax.f32 %v583_v49, 0.0 }
 0x114   :  { %683 = vrot.lane.b32.xlu2 %v627_v53, %s1292_s1 }
 0x115   :  { %v574_v57 = vpop.f32.mrf.mxu2 }
 0x116   :  { %v624_v2 = vmax.f32 %v574_v57, 0.0 }
 0x117   :  { %v2277_v48 = vpop.f32.mrf.mxu0 }
 0x118   :  { %634 = vrot.lane.b32.xlu0 %v605_v60, %s1292_s1  ;;  %v390_v60 = vld [vmem:[%s2598_s0 + $0x90] sm:$0xff] }
 0x11a   :  { %1239 = vmatmul.msk.f32.gmra.mxu0 %vm406_vm0, %v390_v60  ;;  %v586_v60 = vpop.f32.mrf.mxu3 }
 0x11d   :  { %v577_v54 = vpop.f32.mrf.mxu2 }
 0x11e   :  { %v625_v59 = vmax.f32 %v577_v54, 0.0 }
 0x11f   :  { %v523_v61 = vpop.f32.mrf.mxu0 }
 0x120   :  { %v607_v51 = vmax.f32 %v523_v61, 0.0  ;;  %679 = vrot.lane.b32.xlu1 %v625_v59, %s1292_s1 }
 0x122   :  { %638 = vrot.lane.b32.xlu0 %v607_v51, %s1292_s1 }
 0x127   :  { %v526_v52 = vpop.f32.mrf.mxu0 }
 0x12f   :  { %v529_v54 = vpop.f32.mrf.mxu0 }
 0x130   :  { %v609_v50 = vmax.f32 %v529_v54, 0.0 }
 0x132   :  { %642 = vrot.lane.b32.xlu1 %v609_v50, %s1292_s1 }
 0x136   :  { %v589_v54 = vpop.f32.mrf.mxu3 }
 0x137   :  { %v532_v61 = vpop.f32.mrf.mxu0 }
 0x13f   :  { %v535_v58 = vpop.f32.mrf.mxu0 }
 0x140   :  { %v611_v59 = vmax.f32 %v535_v58, 0.0 }
 0x142   :  { %646 = vrot.lane.b32.xlu1 %v611_v59, %s1292_s1  ;;  %v629_v59 = vmax.f32 %v589_v54, 0.0 }
 0x146   :  { %v2296_v58 = vpop.f32.mrf.mxu3 }
 0x147   :  { %v538_v51 = vpop.f32.mrf.mxu0 }
 0x14f   :  { %v541_v62 = vpop.f32.mrf.mxu0 }
 0x150   :  { %v613_v49 = vmax.f32 %v541_v62, 0.0 }
 0x152   :  { %650 = vrot.lane.b32.xlu2 %v613_v49, %s1292_s1  ;;  %v595_v49 = vpop.f32.mrf.mxu3 }
 0x157   :  { %v544_v32 = vpop.f32.mrf.mxu0 }
 0x15a   :  { %v598_v34 = vpop.f32.mrf.mxu3 }
 0x15f   :  { %v547_v55 = vpop.f32.mrf.mxu0 }
 0x160   :  { %v615_v63 = vmax.f32 %v547_v55, 0.0  ;;  %v631_v55 = vmax.f32 %v595_v49, 0.0 }
 0x162   :  { %654 = vrot.lane.b32.xlu2 %v615_v63, %s1292_s1 }
 0x167   :  { %v550_v53 = vpop.f32.mrf.mxu0 }
 0x16f   :  { %v553_v16 = vpop.f32.mrf.mxu0 }
 0x170   :  { %v617_v50 = vmax.f32 %v553_v16, 0.0 }
 0x172   :  { %658 = vrot.lane.b32.xlu0 %v617_v50, %s1292_s1 }
 0x177   :  { %v556_v0 = vpop.f32.mrf.mxu0 }
 0x17a   :  { %687 = vrot.lane.b32.xlu0 %v629_v59, %s1292_s1 }
 0x17f   :  { %v559_v62 = vpop.f32.mrf.mxu0 }
 0x180   :  { %v619_v33 = vmax.f32 %v559_v62, 0.0  ;;  %v606_v62 = vmax.f32 %v2277_v48, 0.0 }
 0x182   :  { %v671_v17 = vpop.permute.xlu0 %670  ;;  %662 = vrot.lane.b32.xlu1 %v619_v33, %s1292_s1  ;;  %v601_v33 = vpop.f32.mrf.mxu3 }
 0x183   :  { %v633_v56 = vmax.f32 %v601_v33, 0.0  ;;  %v610_v33 = vmax.f32 %v532_v61, 0.0  ;;  %v618_v61 = vmax.f32 %v556_v0, 0.0 }
 0x187   :  { %v562_v63 = vpop.f32.mrf.mxu0 }
 0x18a   :  { %v635_v16 = vpop.permute.xlu0 %634  ;;  %691 = vrot.lane.b32.xlu1 %v631_v55, %s1292_s1  ;;  %v684_v55 = vpop.permute.xlu2 %683 }
 0x18b   :  { %v2302_v50 = vadd.f32 %v635_v16, %v604_v1  ;;  %v608_v16 = vmax.f32 %v526_v52, 0.0 }
 0x18d   :  { %2733 = vst [vmem:[#allocation137_spill] sm:$0xff] %v2302_v50 }
 0x18f   :  { %v565_v54 = vpop.f32.mrf.mxu0 }
 0x190   :  { %v621_v18 = vmax.f32 %v565_v54, 0.0 }
 0x192   :  { %v680_v59 = vpop.permute.xlu1 %679  ;;  %666 = vrot.lane.b32.xlu2 %v621_v18, %s1292_s1  ;;  %v580_v1 = vpop.f32.mrf.mxu2 }
 0x193   :  { %v2306_v35 = vadd.f32 %v680_v59, %v624_v2  ;;  %v626_v50 = vmax.f32 %v580_v1, 0.0  ;;  %v612_v59 = vmax.f32 %v538_v51, 0.0 }
 0x194   :  { %v639_v49 = vpop.permute.xlu0 %638 }
 0x195   :  { %2734 = vst [vmem:[#allocation138_spill] sm:$0xff] %v2306_v35  ;;  %v2308_v19 = vadd.f32 %v639_v49, %v606_v62  ;;  %v2313_v3 = vadd.f32 %v684_v55, %v626_v50  ;;  %v628_v55 = vmax.f32 %v586_v60, 0.0 }
 0x197   :  { %2735 = vst [vmem:[#allocation139_spill] sm:$0xff] %v2308_v19  ;;  %v568_v18 = vpop.f32.mrf.mxu0  ;;  %v614_v19 = vmax.f32 %v544_v32, 0.0 }
 0x198   :  { %v622_v48 = vmax.f32 %v568_v18, 0.0  ;;  %v620_v18 = vmax.f32 %v562_v63, 0.0 }
 0x19a   :  { %695 = vrot.lane.b32.xlu2 %v633_v56, %s1292_s1  ;;  %v2315_v2 = vadd.f32 %v671_v17, %v622_v48 }
 0x1a4   :  { %v643_v54 = vpop.permute.xlu1 %642 }
 0x1a5   :  { %v2311_v57 = vadd.f32 %v643_v54, %v608_v16  ;;  %v616_v16 = vmax.f32 %v550_v53, 0.0  ;;  %v630_v53 = vmax.f32 %v2296_v58, 0.0 }
 0x1ac   :  { %v651_v35 = vpop.permute.xlu2 %650 }
 0x1ad   :  { %v2317_v62 = vadd.f32 %v651_v35, %v612_v59  ;;  %v632_v59 = vmax.f32 %v598_v34, 0.0 }
 0x1b4   :  { %v647_v49 = vpop.permute.xlu1 %646 }
 0x1b5   :  { %v2319_v56 = vadd.f32 %v647_v49, %v610_v33 }
 0x1bc   :  { %v655_v52 = vpop.permute.xlu2 %654 }
 0x1bd   :  { %v2321_v1 = vadd.f32 %v655_v52, %v614_v19 }
 0x1e4   :  { %v659_v54 = vpop.permute.xlu0 %658 }
 0x1e5   :  { %v2323_v50 = vadd.f32 %v659_v54, %v616_v16 }
 0x1ec   :  { %v688_v17 = vpop.permute.xlu0 %687  ;;  %v667_v48 = vpop.permute.xlu2 %666 }
 0x1ed   :  { %v2325_v51 = vadd.f32 %v688_v17, %v628_v55  ;;  %v2327_v35 = vadd.f32 %v667_v48, %v620_v18 }
 0x1f4   :  { %v663_v33 = vpop.permute.xlu1 %662  ;;  %v696_v49 = vpop.permute.xlu2 %695 }
 0x1f5   :  { %v2329_v32 = vadd.f32 %v663_v33, %v618_v61  ;;  %v2331_v19 = vadd.f32 %v696_v49, %v632_v59 }
 0x1fc   :  { %v692_v52 = vpop.permute.xlu1 %691 }
 0x1fd   :  { %v2334_v16 = vadd.f32 %v692_v52, %v630_v53 }
 0x1fe   :  { %1288 = dma.done.wait [#allocation4], 20480 }
 0x1ff   :  { %1289 = vsyncadd [#allocation4], 4294946816  ;;  %928 = vmatpush.msrb.mxu3 %v1588_v47  ;;  %883 = vmatpush.msra.mxu1 %v1423_v14  ;;  %v2736_v0 = vld [vmem:[#allocation16_spill] sm:$0xff]  ;;  %v2760_v31 = vld [vmem:[#allocation70_spill] sm:$0xff]  ;;  %vm1189_vm1 = vcmask 7168   ;;  %vm1118_vm2 = vcmask 523264  }
 0x200   :  { %906 = vmatpush.msrb.mxu2 %v1503_v30  ;;  %v2747_v14 = vld [vmem:[#allocation40_spill] sm:$0xff]  ;;  %v2759_v30 = vld [vmem:[#allocation53_spill] sm:$0xff]  ;;  %v2776_v63 = vld [vmem:[#allocation31_spill] sm:$0xff]  ;;  %s1294_s26 = smov [#allocation8]   ;;  %s1200_s30 = sshll.u32 %s2608_s10, 4  ;;  %s1201_s30 = int_to_ptr.hbm [resolvable:$true] %s1200_s30 }
 0x201   :  { %929 = vmatpush.msrb.mxu3 %v1583_v46  ;;  %884 = vmatpush.msra.mxu1 %v1418_v13  ;;  %v2746_v13 = vld [vmem:[#allocation17_spill] sm:$0xff]  ;;  %v2748_v15 = vld [vmem:[#allocation56_spill] sm:$0xff]  ;;  %v2772_v46 = vld [vmem:[#allocation66_spill] sm:$0xff]  ;;  %s1198_s27 = sshll.u32 %s1294_s26, 4  ;;  %s1199_s27 = int_to_ptr.vmem [resolvable:$true] %s1198_s27 }
 0x202   :  { %907 = vmatpush.msrb.mxu2 %v1498_v29  ;;  %v2758_v29 = vld [vmem:[#allocation37_spill] sm:$0xff]  ;;  %v2761_v34 = vld [vmem:[#allocation36_spill] sm:$0xff]  ;;  %v2777_v54 = vld [vmem:[#allocation47_spill] sm:$0xff] }
 0x203   :  { %930 = vmatpush.msrb.mxu3 %v1578_v45  ;;  %885 = vmatpush.msra.mxu1 %v1413_v12  ;;  %v2745_v12 = vld [vmem:[#allocation13_spill] sm:$0xff]  ;;  %v2773_v47 = vld [vmem:[#allocation32_spill] sm:$0xff]  ;;  %v2779_v18 = vld [vmem:[#allocation30_spill] sm:$0xff] }
 0x204   :  { %908 = vmatpush.msrb.mxu2 %v1493_v28  ;;  %v2757_v28 = vld [vmem:[#allocation71_spill] sm:$0xff]  ;;  %v2771_v45 = vld [vmem:[#allocation49_spill] sm:$0xff]  ;;  %v2774_v60 = vld [vmem:[#allocation48_spill] sm:$0xff] }
 0x205   :  { %931 = vmatpush.msrb.mxu3 %v1573_v44  ;;  %886 = vmatpush.msra.mxu1 %v1408_v11  ;;  %v2743_v11 = vld [vmem:[#allocation18_spill] sm:$0xff]  ;;  %v2770_v44 = vld [vmem:[#allocation33_spill] sm:$0xff]  ;;  %v2778_v55 = vld [vmem:[#allocation64_spill] sm:$0xff] }
 0x206   :  { %909 = vmatpush.msrb.mxu2 %v1488_v27  ;;  %v2756_v27 = vld [vmem:[#allocation54_spill] sm:$0xff]  ;;  %v2775_v58 = vld [vmem:[#allocation65_spill] sm:$0xff]  ;;  %v2781_v48 = vld [vmem:[#allocation63_spill] sm:$0xff] }
 0x207   :  { %932 = vmatpush.msrb.mxu3 %v1568_v43  ;;  %887 = vmatpush.msra.mxu1 %v1403_v10  ;;  %v2742_v10 = vld [vmem:[#allocation14_spill] sm:$0xff]  ;;  %v2769_v43 = vld [vmem:[#allocation67_spill] sm:$0xff]  ;;  %v2782_v61 = vld [vmem:[#allocation29_spill] sm:$0xff] }
 0x208   :  { %910 = vmatpush.msrb.mxu2 %v1483_v26  ;;  %v2755_v26 = vld [vmem:[#allocation38_spill] sm:$0xff]  ;;  %v2783_v59 = vld [vmem:[#allocation45_spill] sm:$0xff]  ;;  %v2785_v49 = vld [vmem:[#allocation28_spill] sm:$0xff] }
 0x209   :  { %933 = vmatpush.msrb.mxu3 %v1563_v42  ;;  %888 = vmatpush.msra.mxu1 %v1398_v9  ;;  %v2740_v9 = vld [vmem:[#allocation19_spill] sm:$0xff]  ;;  %v2768_v42 = vld [vmem:[#allocation50_spill] sm:$0xff]  ;;  %v2787_v53 = vld [vmem:[#allocation61_spill] sm:$0xff] }
 0x20a   :  { %911 = vmatpush.msrb.mxu2 %v1478_v25  ;;  %v2754_v25 = vld [vmem:[#allocation137_spill] sm:$0xff]  ;;  %v2780_v17 = vld [vmem:[#allocation46_spill] sm:$0xff]  ;;  %v2788_v52 = vld [vmem:[#allocation27_spill] sm:$0xff] }
 0x20b   :  { %934 = vmatpush.msrb.mxu3 %v1558_v41  ;;  %889 = vmatpush.msra.mxu1 %v1393_v8  ;;  %v2739_v8 = vld [vmem:[#allocation15_spill] sm:$0xff]  ;;  %v2767_v41 = vld [vmem:[#allocation34_spill] sm:$0xff] }
 0x20c   :  { %912 = vmatpush.msrb.mxu2 %v1473_v24  ;;  %v2753_v24 = vld [vmem:[#allocation72_spill] sm:$0xff]  ;;  %v2784_v33 = vld [vmem:[#allocation62_spill] sm:$0xff] }
 0x20d   :  { %935 = vmatpush.msrb.mxu3 %v1553_v40  ;;  %890 = vmatpush.msra.mxu1 %v1388_v7  ;;  %v2737_v7 = vld [vmem:[#allocation20_spill] sm:$0xff] }
 0x20e   :  { %913 = vmatpush.msrb.mxu2 %v1468_v23  ;;  %v2752_v23 = vld [vmem:[#allocation55_spill] sm:$0xff]  ;;  %v2766_v40 = vld [vmem:[#allocation68_spill] sm:$0xff] }
 0x20f   :  { %936 = vmatpush.msrb.mxu3 %v1548_v39  ;;  %891 = vmatpush.msra.mxu1 %v1383_v6  ;;  %v2738_v6 = vld [vmem:[#allocation24_spill] sm:$0xff]  ;;  %v2765_v39 = vld [vmem:[#allocation51_spill] sm:$0xff] }
 0x210   :  { %914 = vmatpush.msrb.mxu2 %v1463_v22  ;;  %v2751_v22 = vld [vmem:[#allocation39_spill] sm:$0xff] }
 0x211   :  { %937 = vmatpush.msrb.mxu3 %v1543_v38  ;;  %892 = vmatpush.msra.mxu1 %v1378_v5  ;;  %v2741_v5 = vld [vmem:[#allocation23_spill] sm:$0xff] }
 0x212   :  { %915 = vmatpush.msrb.mxu2 %v1458_v21  ;;  %v2750_v21 = vld [vmem:[#allocation139_spill] sm:$0xff] }
 0x213   :  { %938 = vmatpush.msrb.mxu3 %v1538_v37  ;;  %893 = vmatpush.msra.mxu1 %v1373_v4  ;;  %v2744_v4 = vld [vmem:[#allocation22_spill] sm:$0xff]  ;;  %v2763_v37 = vld [vmem:[#allocation69_spill] sm:$0xff]  ;;  %v2764_v38 = vld [vmem:[#allocation35_spill] sm:$0xff] }
 0x214   :  { %916 = vmatpush.msrb.mxu2 %v1453_v20  ;;  %v2749_v20 = vld [vmem:[#allocation21_spill] sm:$0xff] }
 0x215   :  { %939 = vmatpush.msrb.mxu3 %v1533_v36  ;;  %894 = vmatpush.msra.mxu1 %v2736_v0  ;;  %v2762_v36 = vld [vmem:[#allocation52_spill] sm:$0xff]  ;;  %v2789_v0 = vld [vmem:[#allocation43_spill] sm:$0xff] }
 0x216   :  { %917 = vmatpush.msrb.mxu2 %v2737_v7  ;;  %v2790_v7 = vld [vmem:[#allocation60_spill] sm:$0xff] }
 0x217   :  { %940 = vmatpush.msrb.mxu3 %v2738_v6  ;;  %895 = vmatpush.msra.mxu1 %v2739_v8  ;;  %v2791_v6 = vld [vmem:[#allocation26_spill] sm:$0xff] }
 0x218   :  { %918 = vmatpush.msrb.mxu2 %v2740_v9  ;;  %v2792_v8 = vld [vmem:[#allocation42_spill] sm:$0xff]  ;;  %v2793_v9 = vld [vmem:[#allocation59_spill] sm:$0xff] }
 0x219   :  { %941 = vmatpush.msrb.mxu3 %v2741_v5  ;;  %896 = vmatpush.msra.mxu1 %v2742_v10  ;;  %v2794_v5 = vld [vmem:[#allocation25_spill] sm:$0xff] }
 0x21a   :  { %919 = vmatpush.msrb.mxu2 %v2743_v11  ;;  %v2795_v10 = vld [vmem:[#allocation41_spill] sm:$0xff]  ;;  %v2796_v11 = vld [vmem:[#allocation58_spill] sm:$0xff] }
 0x21b   :  { %942 = vmatpush.msrb.mxu3 %v2744_v4  ;;  %897 = vmatpush.msra.mxu1 %v2745_v12  ;;  %v2797_v4 = vld [vmem:[#allocation88_spill] sm:$0xff] }
 0x21c   :  { %920 = vmatpush.msrb.mxu2 %v2746_v13  ;;  %898 = vmatmul.f32.vlgmr.msra.gmra.mxu1 %v2754_v25  ;;  %v2798_v12 = vld [vmem:[#allocation104_spill] sm:$0xff]  ;;  %v2799_v13 = vld [vmem:[#allocation57_spill] sm:$0xff]  ;;  %v2808_v25 = vld [vmem:[#allocation118_spill] sm:$0xff] }
 0x21d   :  { %951 = vmatpush.msrb.mxu1 %v2747_v14  ;;  %943 = vmatpush.msrb.mxu3 %v2749_v20  ;;  %v2800_v14 = vld [vmem:[#allocation87_spill] sm:$0xff]  ;;  %v2802_v20 = vld [vmem:[#allocation120_spill] sm:$0xff] }
 0x21e   :  { %974 = vmatpush.msra.mxu2 %v2748_v15  ;;  %944 = vmatmul.f32.vlgmr.msrb.gmra.mxu3 %v2311_v57  ;;  %v2786_v57 = vld [vmem:[#allocation44_spill] sm:$0xff]  ;;  %v2801_v15 = vld [vmem:[#allocation103_spill] sm:$0xff] }
 0x21f   :  { %921 = vmatmul.f32.vlgmr.msrb.gmra.mxu2 %v2750_v21  ;;  %952 = vmatpush.msrb.mxu1 %v2751_v22  ;;  %v2803_v21 = vld [vmem:[#allocation86_spill] sm:$0xff] }
 0x220   :  { %975 = vmatpush.msra.mxu2 %v2752_v23  ;;  %997 = vmatpush.msra.mxu3 %v2753_v24  ;;  %v2804_v22 = vld [vmem:[#allocation102_spill] sm:$0xff]  ;;  %v2806_v23 = vld [vmem:[#allocation85_spill] sm:$0xff] }
 0x221   :  { %953 = vmatpush.msrb.mxu1 %v2755_v26  ;;  %v2807_v24 = vld [vmem:[#allocation101_spill] sm:$0xff]  ;;  %v2810_v26 = vld [vmem:[#allocation100_spill] sm:$0xff] }
 0x222   :  { %976 = vmatpush.msra.mxu2 %v2756_v27  ;;  %998 = vmatpush.msra.mxu3 %v2757_v28  ;;  %v2811_v27 = vld [vmem:[#allocation117_spill] sm:$0xff]  ;;  %v2813_v28 = vld [vmem:[#allocation99_spill] sm:$0xff] }
 0x223   :  { %954 = vmatpush.msrb.mxu1 %v2758_v29  ;;  %v2814_v29 = vld [vmem:[#allocation116_spill] sm:$0xff] }
 0x224   :  { %977 = vmatpush.msra.mxu2 %v2759_v30  ;;  %999 = vmatpush.msra.mxu3 %v2760_v31  ;;  %v2815_v30 = vld [vmem:[#allocation82_spill] sm:$0xff] }
 0x225   :  { %955 = vmatpush.msrb.mxu1 %v2761_v34  ;;  %v2816_v31 = vld [vmem:[#allocation98_spill] sm:$0xff]  ;;  %v2817_v34 = vld [vmem:[#allocation115_spill] sm:$0xff] }
 0x226   :  { %978 = vmatpush.msra.mxu2 %v2762_v36  ;;  %1000 = vmatpush.msra.mxu3 %v2763_v37  ;;  %v2818_v36 = vld [vmem:[#allocation81_spill] sm:$0xff] }
 0x227   :  { %924 = vmatmul.f32.gmra.mxu2 %v2323_v50  ;;  %956 = vmatpush.msrb.mxu1 %v2764_v38  ;;  %v2819_v37 = vld [vmem:[#allocation97_spill] sm:$0xff]  ;;  %v2820_v38 = vld [vmem:[#allocation114_spill] sm:$0xff] }
 0x228   :  { %979 = vmatpush.msra.mxu2 %v2765_v39  ;;  %1001 = vmatpush.msra.mxu3 %v2766_v40  ;;  %v2821_v39 = vld [vmem:[#allocation80_spill] sm:$0xff] }
 0x229   :  { %901 = vmatmul.f32.gmra.mxu1 %v2321_v1  ;;  %947 = vmatmul.f32.gmra.mxu3 %v2329_v32  ;;  %v2822_v40 = vld [vmem:[#allocation96_spill] sm:$0xff] }
 0x22a   :  { %957 = vmatpush.msrb.mxu1 %v2767_v41  ;;  %980 = vmatpush.msra.mxu2 %v2768_v42  ;;  %v2823_v41 = vld [vmem:[#allocation113_spill] sm:$0xff]  ;;  %v2824_v42 = vld [vmem:[#allocation79_spill] sm:$0xff] }
 0x22b   :  { %1002 = vmatpush.msra.mxu3 %v2769_v43  ;;  %v2825_v43 = vld [vmem:[#allocation95_spill] sm:$0xff] }
 0x22c   :  { %958 = vmatpush.msrb.mxu1 %v2770_v44  ;;  %981 = vmatpush.msra.mxu2 %v2771_v45  ;;  %v2826_v44 = vld [vmem:[#allocation112_spill] sm:$0xff]  ;;  %v2827_v45 = vld [vmem:[#allocation78_spill] sm:$0xff] }
 0x22d   :  { %1003 = vmatpush.msra.mxu3 %v2772_v46  ;;  %v2828_v46 = vld [vmem:[#allocation94_spill] sm:$0xff] }
 0x22e   :  { %959 = vmatpush.msrb.mxu1 %v2773_v47  ;;  %982 = vmatpush.msra.mxu2 %v2774_v60  ;;  %v2829_v47 = vld [vmem:[#allocation111_spill] sm:$0xff]  ;;  %v2830_v60 = vld [vmem:[#allocation77_spill] sm:$0xff] }
 0x22f   :  { %1004 = vmatpush.msra.mxu3 %v2775_v58  ;;  %v2831_v58 = vld [vmem:[#allocation93_spill] sm:$0xff] }
 0x230   :  { %960 = vmatpush.msrb.mxu1 %v2776_v63  ;;  %983 = vmatpush.msra.mxu2 %v2777_v54  ;;  %v2832_v63 = vld [vmem:[#allocation110_spill] sm:$0xff] }
 0x231   :  { %1005 = vmatpush.msra.mxu3 %v2778_v55  ;;  %v2833_v54 = vld [vmem:[#allocation138_spill] sm:$0xff]  ;;  %v2834_v55 = vld [vmem:[#allocation76_spill] sm:$0xff] }
 0x232   :  { %961 = vmatpush.msrb.mxu1 %v2779_v18  ;;  %984 = vmatpush.msra.mxu2 %v2780_v17  ;;  %v2835_v18 = vld [vmem:[#allocation92_spill] sm:$0xff]  ;;  %v2836_v17 = vld [vmem:[#allocation109_spill] sm:$0xff] }
 0x233   :  { %1006 = vmatpush.msra.mxu3 %v2781_v48  ;;  %v2837_v48 = vld [vmem:[#allocation75_spill] sm:$0xff] }
 0x234   :  { %962 = vmatpush.msrb.mxu1 %v2782_v61  ;;  %985 = vmatpush.msra.mxu2 %v2783_v59  ;;  %v2838_v61 = vld [vmem:[#allocation91_spill] sm:$0xff]  ;;  %v2839_v59 = vld [vmem:[#allocation108_spill] sm:$0xff] }
 0x235   :  { %1007 = vmatpush.msra.mxu3 %v2784_v33  ;;  %v2840_v33 = vld [vmem:[#allocation74_spill] sm:$0xff] }
 0x236   :  { %963 = vmatpush.msrb.mxu1 %v2785_v49  ;;  %986 = vmatpush.msra.mxu2 %v2786_v57  ;;  %v2841_v49 = vld [vmem:[#allocation90_spill] sm:$0xff]  ;;  %v2842_v57 = vld [vmem:[#allocation107_spill] sm:$0xff] }
 0x237   :  { %1008 = vmatpush.msra.mxu3 %v2787_v53  ;;  %v2843_v53 = vld [vmem:[#allocation73_spill] sm:$0xff] }
 0x238   :  { %964 = vmatpush.msrb.mxu1 %v2788_v52  ;;  %987 = vmatpush.msra.mxu2 %v2789_v0  ;;  %v2844_v52 = vld [vmem:[#allocation89_spill] sm:$0xff]  ;;  %v2845_v0 = vld [vmem:[#allocation106_spill] sm:$0xff] }
 0x239   :  { %1009 = vmatpush.msra.mxu3 %v2790_v7  ;;  %v2846_v7 = vld [vmem:[#allocation136_spill] sm:$0xff] }
 0x23a   :  { %965 = vmatpush.msrb.mxu1 %v2791_v6  ;;  %988 = vmatpush.msra.mxu2 %v2792_v8  ;;  %v2847_v6 = vld [vmem:[#allocation105_spill] sm:$0xff]  ;;  %v2848_v8 = vld [vmem:[#allocation135_spill] sm:$0xff] }
 0x23b   :  { %1010 = vmatpush.msra.mxu3 %v2793_v9  ;;  %v2849_v9 = vld [vmem:[#allocation134_spill] sm:$0xff] }
 0x23c   :  { %966 = vmatpush.msrb.mxu1 %v2794_v5  ;;  %989 = vmatpush.msra.mxu2 %v2795_v10  ;;  %v2850_v5 = vld [vmem:[#allocation133_spill] sm:$0xff]  ;;  %v2851_v10 = vld [vmem:[#allocation132_spill] sm:$0xff] }
 0x23d   :  { %1011 = vmatpush.msra.mxu3 %v2796_v11  ;;  %990 = vmatmul.f32.vlgmr.msra.gmra.mxu2 %v2317_v62  ;;  %v2805_v62 = vld [vmem:[#allocation119_spill] sm:$0xff]  ;;  %v2854_v11 = vld [vmem:[#allocation129_spill] sm:$0xff] }
 0x23e   :  { %1020 = vmatpush.msra.mxu1 %v2797_v4  ;;  %1043 = vmatpush.msrb.mxu2 %v2798_v12  ;;  %v2856_v4 = vld [vmem:[#allocation127_spill] sm:$0xff]  ;;  %v2857_v12 = vld [vmem:[#allocation126_spill] sm:$0xff] }
 0x23f   :  { %1012 = vmatpush.msra.mxu3 %v2799_v13  ;;  %967 = vmatmul.f32.vlgmr.msrb.gmra.mxu1 %v2319_v56  ;;  %v2812_v56 = vld [vmem:[#allocation83_spill] sm:$0xff]  ;;  %v2858_v13 = vld [vmem:[#allocation125_spill] sm:$0xff] }
 0x240   :  { %1013 = vmatmul.f32.vlgmr.msra.gmra.mxu3 %v2321_v1  ;;  %1021 = vmatpush.msra.mxu1 %v2800_v14  ;;  %v2809_v1 = vld [vmem:[#allocation84_spill] sm:$0xff]  ;;  %v2861_v14 = vld [vmem:[#allocation122_spill] sm:$0xff] }
 0x241   :  { %1044 = vmatpush.msrb.mxu2 %v2801_v15  ;;  %1066 = vmatpush.msrb.mxu3 %v2802_v20 }
 0x242   :  { %1022 = vmatpush.msra.mxu1 %v2803_v21 }
 0x243   :  { %1045 = vmatpush.msrb.mxu2 %v2804_v22  ;;  %1067 = vmatpush.msrb.mxu3 %v2805_v62 }
 0x244   :  { %1023 = vmatpush.msra.mxu1 %v2806_v23 }
 0x245   :  { %1046 = vmatpush.msrb.mxu2 %v2807_v24  ;;  %1068 = vmatpush.msrb.mxu3 %v2808_v25 }
 0x246   :  { %993 = vmatmul.f32.gmra.mxu2 %v2315_v2  ;;  %1024 = vmatpush.msra.mxu1 %v2809_v1 }
 0x247   :  { %1047 = vmatpush.msrb.mxu2 %v2810_v26  ;;  %1069 = vmatpush.msrb.mxu3 %v2811_v27 }
 0x248   :  { %1025 = vmatpush.msra.mxu1 %v2812_v56  ;;  %1016 = vmatmul.f32.gmra.mxu3 %v2833_v54 }
 0x249   :  { %1048 = vmatpush.msrb.mxu2 %v2813_v28  ;;  %1070 = vmatpush.msrb.mxu3 %v2814_v29 }
 0x24a   :  { %970 = vmatmul.f32.gmra.mxu1 %v2327_v35 }
 0x24b   :  { %1026 = vmatpush.msra.mxu1 %v2815_v30  ;;  %1049 = vmatpush.msrb.mxu2 %v2816_v31 }
 0x24c   :  { %1071 = vmatpush.msrb.mxu3 %v2817_v34 }
 0x24d   :  { %1027 = vmatpush.msra.mxu1 %v2818_v36  ;;  %1050 = vmatpush.msrb.mxu2 %v2819_v37 }
 0x24e   :  { %1072 = vmatpush.msrb.mxu3 %v2820_v38 }
 0x24f   :  { %1028 = vmatpush.msra.mxu1 %v2821_v39  ;;  %1051 = vmatpush.msrb.mxu2 %v2822_v40  ;;  %v1135_v40 = vld [vmem:[%s2601_s3 + $0x78] sm:$0xff] }
 0x250   :  { %1073 = vmatpush.msrb.mxu3 %v2823_v41  ;;  %v1134_v41 = vld [vmem:[%s2601_s3 + $0x70] sm:$0xff] }
 0x251   :  { %1029 = vmatpush.msra.mxu1 %v2824_v42  ;;  %1052 = vmatpush.msrb.mxu2 %v2825_v43  ;;  %v1293_v42 = vmov 0.0  }
 0x252   :  { %1074 = vmatpush.msrb.mxu3 %v2826_v44  ;;  %1190 = vst.msk [vmem:[%s2607_s9] sm:$0xff] %vm1189_vm1, %v1293_v42  ;;  %v1133_v44 = vld [vmem:[%s2601_s3 + $0x68] sm:$0xff] }
 0x253   :  { %1030 = vmatpush.msra.mxu1 %v2827_v45  ;;  %1053 = vmatpush.msrb.mxu2 %v2828_v46  ;;  %v1132_v45 = vld [vmem:[%s2601_s3 + $0x60] sm:$0xff] }
 0x254   :  { %1075 = vmatpush.msrb.mxu3 %v2829_v47  ;;  %v1131_v47 = vld [vmem:[%s2601_s3 + $0x58] sm:$0xff] }
 0x255   :  { %1031 = vmatpush.msra.mxu1 %v2830_v60  ;;  %1054 = vmatpush.msrb.mxu2 %v2831_v58  ;;  %v1130_v60 = vld [vmem:[%s2601_s3 + $0x50] sm:$0xff] }
 0x256   :  { %1076 = vmatpush.msrb.mxu3 %v2832_v63  ;;  %v1129_v63 = vld [vmem:[%s2601_s3 + $0x48] sm:$0xff] }
 0x257   :  { %1032 = vmatpush.msra.mxu1 %v2834_v55  ;;  %1055 = vmatpush.msrb.mxu2 %v2835_v18  ;;  %v1128_v55 = vld [vmem:[%s2601_s3 + $0x40] sm:$0xff] }
 0x258   :  { %1077 = vmatpush.msrb.mxu3 %v2836_v17  ;;  %v1127_v17 = vld [vmem:[%s2601_s3 + $0x38] sm:$0xff] }
 0x259   :  { %1033 = vmatpush.msra.mxu1 %v2837_v48  ;;  %1056 = vmatpush.msrb.mxu2 %v2838_v61  ;;  %v1126_v48 = vld [vmem:[%s2601_s3 + $0x30] sm:$0xff] }
 0x25a   :  { %1078 = vmatpush.msrb.mxu3 %v2839_v59  ;;  %v1125_v59 = vld [vmem:[%s2601_s3 + $0x28] sm:$0xff] }
 0x25b   :  { %1034 = vmatpush.msra.mxu1 %v2840_v33  ;;  %1057 = vmatpush.msrb.mxu2 %v2841_v49 }
 0x25c   :  { %1079 = vmatpush.msrb.mxu3 %v2842_v57 }
 0x25d   :  { %1035 = vmatpush.msra.mxu1 %v2843_v53  ;;  %1058 = vmatpush.msrb.mxu2 %v2844_v52  ;;  %v1124_v52 = vld [vmem:[%s2601_s3 + $0x20] sm:$0xff] }
 0x25e   :  { %1080 = vmatpush.msrb.mxu3 %v2845_v0  ;;  %1036 = vmatmul.f32.vlgmr.msra.gmra.mxu1 %v2323_v50  ;;  %v2852_v50 = vld [vmem:[#allocation131_spill] sm:$0xff] }
 0x25f   :  { %1059 = vmatmul.f32.vlgmr.msrb.gmra.mxu2 %v2329_v32  ;;  %1089 = vmatpush.msrb.mxu1 %v2846_v7  ;;  %v2853_v32 = vld [vmem:[#allocation130_spill] sm:$0xff]  ;;  %v1123_v7 = vld [vmem:[%s2601_s3 + $0x18] sm:$0xff] }
 0x260   :  { %1081 = vmatpush.msrb.mxu3 %v2847_v6  ;;  %1136 = vmatpush.msra.mxu2 %v1135_v40 }
 0x261   :  { %1082 = vmatmul.f32.vlgmr.msrb.gmra.mxu3 %v2327_v35  ;;  %1090 = vmatpush.msrb.mxu1 %v2848_v8  ;;  %v2855_v35 = vld [vmem:[#allocation128_spill] sm:$0xff]  ;;  %v1122_v8 = vld [vmem:[%s2601_s3 + $0x10] sm:$0xff] }
 0x262   :  { %1137 = vmatpush.msra.mxu2 %v1134_v41 }
 0x263   :  { %1091 = vmatpush.msrb.mxu1 %v2849_v9 }
 0x264   :  { %1138 = vmatpush.msra.mxu2 %v1133_v44 }
 0x265   :  { %1092 = vmatpush.msrb.mxu1 %v2850_v5  ;;  %v1121_v5 = vld [vmem:[%s2601_s3 + $0x8] sm:$0xff] }
 0x266   :  { %1039 = vmatmul.f32.gmra.mxu1 %v2313_v3  ;;  %v2859_v3 = vld [vmem:[#allocation124_spill] sm:$0xff]  ;;  %1139 = vmatpush.msra.mxu2 %v1132_v45 }
 0x267   :  { %1062 = vmatmul.f32.gmra.mxu2 %v2325_v51  ;;  %1093 = vmatpush.msrb.mxu1 %v2851_v10  ;;  %v2860_v51 = vld [vmem:[#allocation123_spill] sm:$0xff] }
 0x268   :  { %1140 = vmatpush.msra.mxu2 %v1131_v47 }
 0x269   :  { %1085 = vmatmul.f32.gmra.mxu3 %v2334_v16  ;;  %1094 = vmatpush.msrb.mxu1 %v2852_v50  ;;  %v2862_v16 = vld [vmem:[#allocation121_spill] sm:$0xff] }
 0x26a   :  { %1141 = vmatpush.msra.mxu2 %v1130_v60 }
 0x26b   :  { %1095 = vmatpush.msrb.mxu1 %v2853_v32 }
 0x26c   :  { %1142 = vmatpush.msra.mxu2 %v1129_v63 }
 0x26d   :  { %1096 = vmatpush.msrb.mxu1 %v2854_v11  ;;  %v1120_v11 = vld [vmem:[%s2601_s3] sm:$0xff] }
 0x26e   :  { %1143 = vmatpush.msra.mxu2 %v1128_v55 }
 0x26f   :  { %1097 = vmatpush.msrb.mxu1 %v2855_v35  ;;  %v1164_v35 = vld [vmem:[%s2602_s4 + $0x38] sm:$0xff] }
 0x270   :  { %1144 = vmatpush.msra.mxu2 %v1127_v17  ;;  %1176 = vmatpush.msra.mxu3 %v1164_v35 }
 0x271   :  { %1098 = vmatpush.msrb.mxu1 %v2856_v4  ;;  %v1163_v4 = vld [vmem:[%s2602_s4 + $0x30] sm:$0xff] }
 0x272   :  { %1145 = vmatpush.msra.mxu2 %v1126_v48  ;;  %1177 = vmatpush.msra.mxu3 %v1163_v4 }
 0x273   :  { %1099 = vmatpush.msrb.mxu1 %v2857_v12  ;;  %v1162_v12 = vld [vmem:[%s2602_s4 + $0x28] sm:$0xff] }
 0x274   :  { %1146 = vmatpush.msra.mxu2 %v1125_v59  ;;  %1178 = vmatpush.msra.mxu3 %v1162_v12 }
 0x275   :  { %1100 = vmatpush.msrb.mxu1 %v2858_v13  ;;  %v1161_v13 = vld [vmem:[%s2602_s4 + $0x20] sm:$0xff] }
 0x276   :  { %1147 = vmatpush.msra.mxu2 %v1124_v52  ;;  %1179 = vmatpush.msra.mxu3 %v1161_v13 }
 0x277   :  { %1101 = vmatpush.msrb.mxu1 %v2859_v3  ;;  %v1160_v3 = vld [vmem:[%s2602_s4 + $0x18] sm:$0xff] }
 0x278   :  { %1148 = vmatpush.msra.mxu2 %v1123_v7  ;;  %1180 = vmatpush.msra.mxu3 %v1160_v3 }
 0x279   :  { %1102 = vmatpush.msrb.mxu1 %v2860_v51  ;;  %v1159_v51 = vld [vmem:[%s2602_s4 + $0x10] sm:$0xff] }
 0x27a   :  { %1149 = vmatpush.msra.mxu2 %v1122_v8  ;;  %1181 = vmatpush.msra.mxu3 %v1159_v51 }
 0x27b   :  { %1103 = vmatpush.msrb.mxu1 %v2861_v14  ;;  %v1158_v14 = vld [vmem:[%s2602_s4 + $0x8] sm:$0xff] }
 0x27c   :  { %1150 = vmatpush.msra.mxu2 %v1121_v5  ;;  %1182 = vmatpush.msra.mxu3 %v1158_v14 }
 0x27d   :  { %1104 = vmatpush.msrb.mxu1 %v2862_v16 }
 0x27e   :  { %1105 = vmatmul.f32.vlgmr.msrb.gmra.mxu1 %v2315_v2  ;;  %1151 = vmatpush.msra.mxu2 %v1120_v11 }
 0x286   :  { %1108 = vmatmul.f32.gmra.mxu1 %v2331_v19 }
 0x299   :  { %v899_v15 = vpop.f32.mrf.mxu1 }
 0x2a1   :  { %v945_v22 = vpop.f32.mrf.mxu3 }
 0x2a2   :  { %v922_v20 = vpop.f32.mrf.mxu2 }
 0x2a3   :  { %v923_v21 = vadd.f32 %v922_v20, %v899_v15 }
 0x2a5   :  { %v946_v62 = vadd.f32 %v945_v22, %v923_v21  ;;  %v1157_v21 = vld [vmem:[%s2602_s4] sm:$0xff] }
 0x2a6   :  { %v902_v23 = vpop.f32.mrf.mxu1  ;;  %1183 = vmatpush.msra.mxu3 %v1157_v21 }
 0x2aa   :  { %v925_v24 = vpop.f32.mrf.mxu2 }
 0x2ab   :  { %v926_v43 = vadd.f32 %v925_v24, %v902_v23 }
 0x2ac   :  { %v948_v25 = vpop.f32.mrf.mxu3 }
 0x2ad   :  { %v949_v46 = vadd.f32 %v948_v25, %v926_v43 }
 0x2bc   :  { %v968_v1 = vpop.f32.mrf.mxu1 }
 0x2bd   :  { %v969_v26 = vadd.f32 %v968_v1, %v946_v62 }
 0x2c0   :  { %v991_v27 = vpop.f32.mrf.mxu2 }
 0x2c1   :  { %v992_v56 = vadd.f32 %v991_v27, %v969_v26 }
 0x2c3   :  { %v1014_v28 = vpop.f32.mrf.mxu3 }
 0x2c4   :  { %v1015_v29 = vadd.f32 %v1014_v28, %v992_v56 }
 0x2c7   :  { %v971_v30 = vpop.f32.mrf.mxu1 }
 0x2c8   :  { %v972_v58 = vadd.f32 %v971_v30, %v949_v46 }
 0x2c9   :  { %v994_v31 = vpop.f32.mrf.mxu2 }
 0x2ca   :  { %v995_v18 = vadd.f32 %v994_v31, %v972_v58 }
 0x2cb   :  { %v1017_v34 = vpop.f32.mrf.mxu3 }
 0x2cc   :  { %v1018_v61 = vadd.f32 %v1017_v34, %v995_v18 }
 0x2db   :  { %v1037_v2 = vpop.f32.mrf.mxu1 }
 0x2dc   :  { %v1038_v36 = vadd.f32 %v1037_v2, %v1015_v29 }
 0x2e2   :  { %v1060_v19 = vpop.f32.mrf.mxu2 }
 0x2e3   :  { %v1061_v37 = vadd.f32 %v1060_v19, %v1038_v36  ;;  %v1040_v54 = vpop.f32.mrf.mxu1 }
 0x2e4   :  { %v1083_v38 = vpop.f32.mrf.mxu3  ;;  %v1041_v57 = vadd.f32 %v1040_v54, %v1018_v61 }
 0x2e5   :  { %v1084_v39 = vadd.f32 %v1083_v38, %v1061_v37 }
 0x2ea   :  { %v1063_v33 = vpop.f32.mrf.mxu2 }
 0x2eb   :  { %v1064_v0 = vadd.f32 %v1063_v33, %v1041_v57 }
 0x2ec   :  { %v1086_v6 = vpop.f32.mrf.mxu3 }
 0x2ed   :  { %v1087_v9 = vadd.f32 %v1086_v6, %v1064_v0 }
 0x2fb   :  { %v1106_v49 = vpop.f32.mrf.mxu1 }
 0x2fc   :  { %v1107_v53 = vadd.f32 %v1106_v49, %v1084_v39 }
 0x2fe   :  { %v1112_v16 = vmax.f32 %v1107_v53, 0.0 }
 0x303   :  { %v1109_v10 = vpop.f32.mrf.mxu1 }
 0x304   :  { %v1110_v50 = vadd.f32 %v1109_v10, %v1087_v9 }
 0x306   :  { %v1113_v32 = vmax.f32 %v1110_v50, 0.0 }
 0x308   :  { %1115 = vrot.lane.b32.xlu0 %v1113_v32, %s1292_s1 }
 0x37a   :  { %v1116_v15 = vpop.permute.xlu0 %1115 }
 0x37b   :  { %v1119_v20 = vsel %vm1118_vm2, %v1112_v16, %v1116_v15 }
 0x37c   :  { %1152 = vmatmul.f32.vlgmr.msra.gmra.mxu2 %v1119_v20 }
 0x3ff   :  { %v1153_v22 = vpop.f32.mrf.mxu2 }
 0x400   :  { %v1156_v62 = vmax.f32 %v1153_v22, 0.0 }
 0x402   :  { %1251 = vmatmul.msk.f32.vlgmr.msra.gmra.mxu3 %vm1118_vm2, %v1156_v62 }
 0x485   :  { %v1185_v23 = vpop.f32.mrf.mxu3 }
 0x486   :  { %1188 = vst.msk [vmem:[#allocation8] sm:$0xff] %vm1118_vm2, %v1185_v23 }
 0x487   :  { %1203 = dma.vmem_to_hbm [thread:$0]  %s1199_s27, 128, %s1201_s30, [#allocation9]  }
 0x488   :  { %1290 = dma.done.wait [#allocation9], 128  }
 0x489   :  { %1291 = vsyncadd [#allocation9], 4294967168 }
 0x48a   :  { %1210 = vsyncpa [#allocation9], 1 }
 0x48b   :  { %1211 = vsyncmov [#allocation4] }
 0x48e   :  { %s1212_s4 = vpop.sfrf %1211 }
 0x48f   :  { %p1252_p0 = scmp.ne.s32.totalorder %s1212_s4, 0 }
 0x491   :  { %1216 = shalt.err (%p1252_p0)  }

</bundles_post_ra>
